<compile_context>
chip_gen: v5e
topology: v5e:2x2
jax: 0.10.0
libtpu: 0.0.40
codegen_flags: <defaults>
</compile_context>

<pallas_src>
import functools

import jax
import jax.numpy as jnp
from jax import lax
from jax.experimental import pallas as pl
from jax.experimental.pallas import tpu as pltpu


# ------------------------------ fused kernel ---------------------------------
def discriminator_kernel(tok_ref, emb_ref, wih_ref, whh_ref, b_ref,
                         wout_ref, bout_ref, score_ref, gx_scr, seq_scr,
                         *, T, Bp):
    """Fused embedding gather + multi-layer LSTM + Linear(H,1)+sigmoid head.

    tok_ref:  [T*Bp, 1]   i32  time-major token ids (batch padded to 8k rows)
    emb_ref:  [Vp, H]     f32  embedding table (rows padded; padding never selected)
    wih_ref:  [L, H, 4H]  f32  stacked input->gates weights (gate order i,f,g,o)
    whh_ref:  [L, H, 4H]  f32  stacked hidden->gates weights
    b_ref:    [L, 1, 4H]  f32  stacked gate bias (= PyTorch b_ih + b_hh per layer)
    wout_ref: [1, H]      f32  scoring head weight
    bout_ref: [1, 1]      f32  scoring head bias
    score_ref:[Bp, 1]     f32  per-row sigmoid score (output)
    gx_scr:   [T*Bp, 4H]  f32  per-layer precomputed input->gates slab (VMEM)
    seq_scr:  [T*Bp, H]   f32  inter-layer activations, rewritten per layer (VMEM)
    """
    Vp, H = emb_ref.shape
    L = wih_ref.shape[0]
    G = 4 * H

    # In-kernel embedding gather as a one-hot MXU matmul (exact row selection;
    # padded table rows can never match a token id < vocab).
    vocab_iota = lax.broadcasted_iota(jnp.int32, (T * Bp, Vp), 1)
    one_hot = (vocab_iota == tok_ref[...]).astype(jnp.float32)        # [T*Bp, Vp]
    x0 = jnp.dot(one_hot, emb_ref[...],
                 preferred_element_type=jnp.float32)                  # [T*Bp, H]

    # Hoisted once (JAX does not CSE broadcast/iota): tanh-gate lane mask.
    lane = lax.broadcasted_iota(jnp.int32, (Bp, G), 1)
    g_mask = (lane >= 2 * H) & (lane < 3 * H)

    h_last = jnp.zeros((Bp, H), jnp.float32)
    for layer in range(L):                              # static layer unroll
        cur = x0 if layer == 0 else seq_scr[...]        # [T*Bp, H] f32
        w_ih = wih_ref[layer].astype(jnp.bfloat16)      # bf16 only at matmul time
        w_hh = whh_ref[layer].astype(jnp.bfloat16)

        # Bulk (non-recurrent) input->gates matmul for ALL timesteps at once;
        # bias folded in with a single broadcast add.  M = T*Bp, not Bp.
        gx_scr[...] = (jnp.dot(cur.astype(jnp.bfloat16), w_ih,
                               preferred_element_type=jnp.float32)
                       + b_ref[layer])

        def step(t, carry):
            h, c = carry
            row0 = pl.multiple_of(t * Bp, Bp)
            gates = gx_scr[pl.ds(row0, Bp), :] + jnp.dot(
                h.astype(jnp.bfloat16), w_hh, preferred_element_type=jnp.float32)
            # Full-vreg nonlinearity: 1 sigmoid + 1 tanh over all 4H lanes,
            # lane-mask select picks tanh for the g block.  Gate order: i,f,g,o.
            act = jnp.where(g_mask, jnp.tanh(gates), jax.nn.sigmoid(gates))
            i_g = act[:, 0 * H:1 * H]
            f_g = act[:, 1 * H:2 * H]
            g_g = act[:, 2 * H:3 * H]
            o_g = act[:, 3 * H:4 * H]
            c_new = f_g * c + i_g * g_g                 # pointwise stays f32
            h_new = o_g * jnp.tanh(c_new)
            seq_scr[pl.ds(row0, Bp), :] = h_new         # next layer's input
            return h_new, c_new

        h0 = jnp.zeros((Bp, H), jnp.float32)
        c0 = jnp.zeros((Bp, H), jnp.float32)
        # T=8: full unroll keeps LLO visibility; switch to partial unroll if T grows.
        h_last, _ = lax.fori_loop(0, T, step, (h0, c0), unroll=True)

    # Scoring head: Linear(H, 1) + sigmoid as a VPU multiply + lane reduce
    # (no wasteful N=1 MXU matmul).
    logits = jnp.sum(h_last * wout_ref[...], axis=-1, keepdims=True) + bout_ref[...]
    score_ref[...] = jax.nn.sigmoid(logits)


def _discriminator_pallas(tok_col, params, *, T, Bp):
    """tok_col: [T*Bp, 1] i32 -> per-row sigmoid scores [Bp, 1] (one kernel call)."""
    H = params["embedding"].shape[1]
    vmem = pl.BlockSpec(memory_space=pltpu.MemorySpace.VMEM)
    kernel = functools.partial(discriminator_kernel, T=T, Bp=Bp)
    return pl.pallas_call(
        kernel,
        out_shape=jax.ShapeDtypeStruct((Bp, 1), jnp.float32),
        in_specs=[vmem] * 7,
        out_specs=vmem,
        scratch_shapes=[
            pltpu.VMEM((T * Bp, 4 * H), jnp.float32),   # gates_x slab
            pltpu.VMEM((T * Bp, H), jnp.float32),       # inter-layer activations
        ],
        # Footprint today is <1 MiB; explicit limit documents the budget.  If
        # H/T/B grow (esp. on v7x's 64 MiB VMEM), move to a batch-tiled grid with
        # dimension_semantics=("parallel",...) instead of whole-array residency.
        compiler_params=pltpu.CompilerParams(vmem_limit_bytes=32 * 1024 * 1024),
    )(tok_col, params["embedding"], params["w_ih"], params["w_hh"],
      params["b"], params["w_out"], params["b_out"])


# ------------------------------- wrapper glue ---------------------------------
def discriminator_scores(tokens_bt, params):
    """tokens_bt: [N, T] int32 -> per-sequence sigmoid score [N]."""
    N, T = tokens_bt.shape
    Bp = max(8, ((N + 7) // 8) * 8)                     # sublane-pad the batch
    tok = jnp.transpose(tokens_bt, (1, 0))              # [T, N] (token-sized glue only)
    if Bp > N:
        # Padded rows use token 0; their scores are sliced off below.
        tok = jnp.pad(tok, ((0, 0), (0, Bp - N)))
    tok_col = tok.reshape(T * Bp, 1).astype(jnp.int32)
    scores = _discriminator_pallas(tok_col, params, T=T, Bp=Bp)   # [Bp, 1]
    return scores[:N, 0]


def discriminator_forward(x_fake_tokens, y_real_tokens, params):
    """Mirrors Discriminator.forward (WGAN branch); real+fake batched in one call."""
    B = y_real_tokens.shape[0]
    # TODO(synk): fake = self.translate(x) (external generator) is not implemented;
    # fake token ids are supplied directly.  loss.backward() has no Pallas equivalent.
    tokens = jnp.concatenate([y_real_tokens, x_fake_tokens], axis=0)  # [2B, T]
    scores = discriminator_scores(tokens, params)                     # [2B]
    real_loss = jnp.mean(scores[:B])
    fake_loss = jnp.mean(scores[B:])
    return {
        "real_loss": real_loss,
        "fake_loss": fake_loss,
        "loss": fake_loss - real_loss,
    }


def init_params(key, tgt_vocab_size, input_size, hidden_size, n_layers):
    # Embedding dim == hidden_size feeds the LSTM directly, so input_size must match.
    assert input_size == hidden_size
    H = hidden_size
    Vp = ((tgt_vocab_size + 7) // 8) * 8                # sublane-pad the table rows;
    k_emb, k_wih, k_whh, k_b, k_out = jax.random.split(key, 5)
    emb = 0.1 * jax.random.normal(k_emb, (tgt_vocab_size, H), jnp.float32)
    emb = jnp.pad(emb, ((0, Vp - tgt_vocab_size), (0, 0)))  # padded rows never selected
    return {
        # f32 master weights; bf16 casts happen only at matmul time inside the kernel.
        "embedding": emb,
        "w_ih": 0.1 * jax.random.normal(k_wih, (n_layers, H, 4 * H), jnp.float32),
        "w_hh": 0.1 * jax.random.normal(k_whh, (n_layers, H, 4 * H), jnp.float32),
        # Single fused gate bias == PyTorch nn.LSTM's (b_ih + b_hh) per layer.
        "b": 0.01 * jax.random.normal(k_b, (n_layers, 1, 4 * H), jnp.float32),
        "w_out": 0.1 * jax.random.normal(k_out, (1, H), jnp.float32),
        "b_out": jnp.zeros((1, 1), jnp.float32),
    }


if __name__ == "__main__":
    tgt_vocab_size = 50
    hidden_size = 32
    input_size = 32
    n_layers = 2
    B, T = 2, 8

    key = jax.random.PRNGKey(0)
    kp, ky, kx = jax.random.split(key, 3)

    params = init_params(kp, tgt_vocab_size, input_size, hidden_size, n_layers)
    y_real = jax.random.randint(ky, (B, T), 0, tgt_vocab_size, dtype=jnp.int32)
    x_fake = jax.random.randint(kx, (B, T), 0, tgt_vocab_size, dtype=jnp.int32)

    score_map = discriminator_forward(x_fake, y_real, params)
    jax.block_until_ready(score_map["loss"])
    print("KERNEL_OK")
</pallas_src>

<mosaic_0001>
module attributes {stable_mosaic.version = 11 : i64} {
  func.func @discriminator_kernel(%arg0: memref<64x1xi32, #tpu.memory_space<vmem>>, %arg1: memref<56x32xf32, #tpu.memory_space<vmem>>, %arg2: memref<2x32x128xf32, #tpu.memory_space<vmem>>, %arg3: memref<2x32x128xf32, #tpu.memory_space<vmem>>, %arg4: memref<2x1x128xf32, #tpu.memory_space<vmem>>, %arg5: memref<1x32xf32, #tpu.memory_space<vmem>>, %arg6: memref<1x1xf32, #tpu.memory_space<vmem>>, %arg7: memref<8x1xf32, #tpu.memory_space<vmem>>, %arg8: memref<64x128xf32, #tpu.memory_space<vmem>>, %arg9: memref<64x32xf32, #tpu.memory_space<vmem>>) attributes {dimension_semantics = [], scalar_prefetch = 0 : i64, scratch_operands = 2 : i64, tpu.core_type = #tpu.core_type<tc>} {
    %0 = tpu.iota {dimensions = array<i32: 1>} : vector<64x56xi32>
    %c0 = arith.constant 0 : index
    %c0_0 = arith.constant 0 : index
    %1 = vector.load %arg0[%c0, %c0_0] : memref<64x1xi32, #tpu.memory_space<vmem>>, vector<64x1xi32>
    %2 = vector.broadcast %1 : vector<64x1xi32> to vector<64x56xi32>
    %3 = arith.cmpi eq, %0, %2 : vector<64x56xi32>
    %4 = arith.extui %3 : vector<64x56xi1> to vector<64x56xi32>
    %5 = arith.sitofp %4 : vector<64x56xi32> to vector<64x56xf32>
    %c0_1 = arith.constant 0 : index
    %c0_2 = arith.constant 0 : index
    %6 = vector.load %arg1[%c0_1, %c0_2] : memref<56x32xf32, #tpu.memory_space<vmem>>, vector<56x32xf32>
    %cst = arith.constant dense<0.000000e+00> : vector<64x32xf32>
    %7 = tpu.matmul %5, %6, %cst {dimension_numbers = #tpu.dot_dimension_numbers<[1], [0], [0], [1], [0, 0, 1, 1], [], []>} : vector<64x56xf32>, vector<56x32xf32>, vector<64x32xf32> -> vector<64x32xf32>
    %8 = tpu.iota {dimensions = array<i32: 1>} : vector<8x128xi32>
    %c64_i32 = arith.constant 64 : i32
    %9 = vector.broadcast %c64_i32 : i32 to vector<8x128xi32>
    %10 = arith.cmpi sge, %8, %9 : vector<8x128xi32>
    %c96_i32 = arith.constant 96 : i32
    %11 = vector.broadcast %c96_i32 : i32 to vector<8x128xi32>
    %12 = arith.cmpi slt, %8, %11 : vector<8x128xi32>
    %13 = arith.andi %10, %12 : vector<8x128xi1>
    %c0_3 = arith.constant 0 : index
    %c0_4 = arith.constant 0 : index
    %c0_5 = arith.constant 0 : index
    %14 = vector.load %arg2[%c0_3, %c0_4, %c0_5] : memref<2x32x128xf32, #tpu.memory_space<vmem>>, vector<1x32x128xf32>
    %15 = vector.shape_cast %14 : vector<1x32x128xf32> to vector<32x128xf32>
    %16 = arith.truncf %15 : vector<32x128xf32> to vector<32x128xbf16>
    %c0_6 = arith.constant 0 : index
    %c0_7 = arith.constant 0 : index
    %c0_8 = arith.constant 0 : index
    %17 = vector.load %arg3[%c0_6, %c0_7, %c0_8] : memref<2x32x128xf32, #tpu.memory_space<vmem>>, vector<1x32x128xf32>
    %18 = vector.shape_cast %17 : vector<1x32x128xf32> to vector<32x128xf32>
    %19 = arith.truncf %18 : vector<32x128xf32> to vector<32x128xbf16>
    %20 = arith.truncf %7 : vector<64x32xf32> to vector<64x32xbf16>
    %cst_9 = arith.constant dense<0.000000e+00> : vector<64x128xf32>
    %21 = tpu.matmul %20, %16, %cst_9 {dimension_numbers = #tpu.dot_dimension_numbers<[1], [0], [0], [1], [0, 0, 1, 1], [], []>} : vector<64x32xbf16>, vector<32x128xbf16>, vector<64x128xf32> -> vector<64x128xf32>
    %c0_10 = arith.constant 0 : index
    %c0_11 = arith.constant 0 : index
    %c0_12 = arith.constant 0 : index
    %22 = vector.load %arg4[%c0_10, %c0_11, %c0_12] : memref<2x1x128xf32, #tpu.memory_space<vmem>>, vector<1x1x128xf32>
    %23 = vector.shape_cast %22 : vector<1x1x128xf32> to vector<1x128xf32>
    %24 = vector.broadcast %23 : vector<1x128xf32> to vector<64x128xf32>
    %25 = arith.addf %21, %24 : vector<64x128xf32>
    %c0_13 = arith.constant 0 : index
    %c0_14 = arith.constant 0 : index
    %26 = vector.load %arg8[%c0_13, %c0_14] : memref<64x128xf32, #tpu.memory_space<vmem>>, vector<64x128xf32>
    tpu.vector_store %arg8[%c0_13, %c0_14], %25 {strides = array<i32>} : memref<64x128xf32, #tpu.memory_space<vmem>>, vector<64x128xf32>,
    %cst_15 = arith.constant 0.000000e+00 : f32
    %27 = vector.broadcast %cst_15 : f32 to vector<8x32xf32>
    %cst_16 = arith.constant 0.000000e+00 : f32
    %28 = vector.broadcast %cst_16 : f32 to vector<8x32xf32>
    %c0_i32 = arith.constant 0 : i32
    %c8_i32 = arith.constant 8 : i32
    %29 = arith.muli %c0_i32, %c8_i32 : i32
    %30 = tpu.assume_multiple %29, 8 : i32
    %31 = arith.index_cast %30 : i32 to index
    %c0_17 = arith.constant 0 : index
    %32 = vector.load %arg8[%31, %c0_17] : memref<64x128xf32, #tpu.memory_space<vmem>>, vector<8x128xf32>
    %33 = arith.truncf %27 : vector<8x32xf32> to vector<8x32xbf16>
    %cst_18 = arith.constant dense<0.000000e+00> : vector<8x128xf32>
    %34 = tpu.matmul %33, %19, %cst_18 {dimension_numbers = #tpu.dot_dimension_numbers<[1], [0], [0], [1], [0, 0, 1, 1], [], []>} : vector<8x32xbf16>, vector<32x128xbf16>, vector<8x128xf32> -> vector<8x128xf32>
    %35 = arith.addf %32, %34 : vector<8x128xf32>
    %36 = math.tanh %35 : vector<8x128xf32>
    %37 = arith.negf %35 : vector<8x128xf32>
    %38 = math.exp %37 : vector<8x128xf32>
    %cst_19 = arith.constant 1.000000e+00 : f32
    %39 = vector.broadcast %cst_19 : f32 to vector<8x128xf32>
    %40 = arith.addf %39, %38 : vector<8x128xf32>
    %41 = arith.divf %39, %40 : vector<8x128xf32>
    %42 = arith.select %13, %36, %41 : vector<8x128xi1>, vector<8x128xf32>
    %43 = vector.extract_strided_slice %42 {offsets = [0, 0], sizes = [8, 32], strides = [1, 1]} : vector<8x128xf32> to vector<8x32xf32>
    %44 = vector.extract_strided_slice %42 {offsets = [0, 32], sizes = [8, 32], strides = [1, 1]} : vector<8x128xf32> to vector<8x32xf32>
    %45 = vector.extract_strided_slice %42 {offsets = [0, 64], sizes = [8, 32], strides = [1, 1]} : vector<8x128xf32> to vector<8x32xf32>
    %46 = vector.extract_strided_slice %42 {offsets = [0, 96], sizes = [8, 32], strides = [1, 1]} : vector<8x128xf32> to vector<8x32xf32>
    %47 = arith.mulf %44, %28 : vector<8x32xf32>
    %48 = arith.mulf %43, %45 : vector<8x32xf32>
    %49 = arith.addf %47, %48 : vector<8x32xf32>
    %50 = math.tanh %49 : vector<8x32xf32>
    %51 = arith.mulf %46, %50 : vector<8x32xf32>
    %52 = arith.index_cast %30 : i32 to index
    %c0_20 = arith.constant 0 : index
    %53 = vector.load %arg9[%52, %c0_20] : memref<64x32xf32, #tpu.memory_space<vmem>>, vector<8x32xf32>
    tpu.vector_store %arg9[%52, %c0_20], %51 {strides = array<i32>} : memref<64x32xf32, #tpu.memory_space<vmem>>, vector<8x32xf32>,
    %c1_i32 = arith.constant 1 : i32
    %c8_i32_21 = arith.constant 8 : i32
    %54 = arith.muli %c1_i32, %c8_i32_21 : i32
    %55 = tpu.assume_multiple %54, 8 : i32
    %56 = arith.index_cast %55 : i32 to index
    %c0_22 = arith.constant 0 : index
    %57 = vector.load %arg8[%56, %c0_22] : memref<64x128xf32, #tpu.memory_space<vmem>>, vector<8x128xf32>
    %58 = arith.truncf %51 : vector<8x32xf32> to vector<8x32xbf16>
    %cst_23 = arith.constant dense<0.000000e+00> : vector<8x128xf32>
    %59 = tpu.matmul %58, %19, %cst_23 {dimension_numbers = #tpu.dot_dimension_numbers<[1], [0], [0], [1], [0, 0, 1, 1], [], []>} : vector<8x32xbf16>, vector<32x128xbf16>, vector<8x128xf32> -> vector<8x128xf32>
    %60 = arith.addf %57, %59 : vector<8x128xf32>
    %61 = math.tanh %60 : vector<8x128xf32>
    %62 = arith.negf %60 : vector<8x128xf32>
    %63 = math.exp %62 : vector<8x128xf32>
    %cst_24 = arith.constant 1.000000e+00 : f32
    %64 = vector.broadcast %cst_24 : f32 to vector<8x128xf32>
    %65 = arith.addf %64, %63 : vector<8x128xf32>
    %66 = arith.divf %64, %65 : vector<8x128xf32>
    %67 = arith.select %13, %61, %66 : vector<8x128xi1>, vector<8x128xf32>
    %68 = vector.extract_strided_slice %67 {offsets = [0, 0], sizes = [8, 32], strides = [1, 1]} : vector<8x128xf32> to vector<8x32xf32>
    %69 = vector.extract_strided_slice %67 {offsets = [0, 32], sizes = [8, 32], strides = [1, 1]} : vector<8x128xf32> to vector<8x32xf32>
    %70 = vector.extract_strided_slice %67 {offsets = [0, 64], sizes = [8, 32], strides = [1, 1]} : vector<8x128xf32> to vector<8x32xf32>
    %71 = vector.extract_strided_slice %67 {offsets = [0, 96], sizes = [8, 32], strides = [1, 1]} : vector<8x128xf32> to vector<8x32xf32>
    %72 = arith.mulf %69, %49 : vector<8x32xf32>
    %73 = arith.mulf %68, %70 : vector<8x32xf32>
    %74 = arith.addf %72, %73 : vector<8x32xf32>
    %75 = math.tanh %74 : vector<8x32xf32>
    %76 = arith.mulf %71, %75 : vector<8x32xf32>
    %77 = arith.index_cast %55 : i32 to index
    %c0_25 = arith.constant 0 : index
    %78 = vector.load %arg9[%77, %c0_25] : memref<64x32xf32, #tpu.memory_space<vmem>>, vector<8x32xf32>
    tpu.vector_store %arg9[%77, %c0_25], %76 {strides = array<i32>} : memref<64x32xf32, #tpu.memory_space<vmem>>, vector<8x32xf32>,
    %c2_i32 = arith.constant 2 : i32
    %c8_i32_26 = arith.constant 8 : i32
    %79 = arith.muli %c2_i32, %c8_i32_26 : i32
    %80 = tpu.assume_multiple %79, 8 : i32
    %81 = arith.index_cast %80 : i32 to index
    %c0_27 = arith.constant 0 : index
    %82 = vector.load %arg8[%81, %c0_27] : memref<64x128xf32, #tpu.memory_space<vmem>>, vector<8x128xf32>
    %83 = arith.truncf %76 : vector<8x32xf32> to vector<8x32xbf16>
    %cst_28 = arith.constant dense<0.000000e+00> : vector<8x128xf32>
    %84 = tpu.matmul %83, %19, %cst_28 {dimension_numbers = #tpu.dot_dimension_numbers<[1], [0], [0], [1], [0, 0, 1, 1], [], []>} : vector<8x32xbf16>, vector<32x128xbf16>, vector<8x128xf32> -> vector<8x128xf32>
    %85 = arith.addf %82, %84 : vector<8x128xf32>
    %86 = math.tanh %85 : vector<8x128xf32>
    %87 = arith.negf %85 : vector<8x128xf32>
    %88 = math.exp %87 : vector<8x128xf32>
    %cst_29 = arith.constant 1.000000e+00 : f32
    %89 = vector.broadcast %cst_29 : f32 to vector<8x128xf32>
    %90 = arith.addf %89, %88 : vector<8x128xf32>
    %91 = arith.divf %89, %90 : vector<8x128xf32>
    %92 = arith.select %13, %86, %91 : vector<8x128xi1>, vector<8x128xf32>
    %93 = vector.extract_strided_slice %92 {offsets = [0, 0], sizes = [8, 32], strides = [1, 1]} : vector<8x128xf32> to vector<8x32xf32>
    %94 = vector.extract_strided_slice %92 {offsets = [0, 32], sizes = [8, 32], strides = [1, 1]} : vector<8x128xf32> to vector<8x32xf32>
    %95 = vector.extract_strided_slice %92 {offsets = [0, 64], sizes = [8, 32], strides = [1, 1]} : vector<8x128xf32> to vector<8x32xf32>
    %96 = vector.extract_strided_slice %92 {offsets = [0, 96], sizes = [8, 32], strides = [1, 1]} : vector<8x128xf32> to vector<8x32xf32>
    %97 = arith.mulf %94, %74 : vector<8x32xf32>
    %98 = arith.mulf %93, %95 : vector<8x32xf32>
    %99 = arith.addf %97, %98 : vector<8x32xf32>
    %100 = math.tanh %99 : vector<8x32xf32>
    %101 = arith.mulf %96, %100 : vector<8x32xf32>
    %102 = arith.index_cast %80 : i32 to index
    %c0_30 = arith.constant 0 : index
    %103 = vector.load %arg9[%102, %c0_30] : memref<64x32xf32, #tpu.memory_space<vmem>>, vector<8x32xf32>
    tpu.vector_store %arg9[%102, %c0_30], %101 {strides = array<i32>} : memref<64x32xf32, #tpu.memory_space<vmem>>, vector<8x32xf32>,
    %c3_i32 = arith.constant 3 : i32
    %c8_i32_31 = arith.constant 8 : i32
    %104 = arith.muli %c3_i32, %c8_i32_31 : i32
    %105 = tpu.assume_multiple %104, 8 : i32
    %106 = arith.index_cast %105 : i32 to index
    %c0_32 = arith.constant 0 : index
    %107 = vector.load %arg8[%106, %c0_32] : memref<64x128xf32, #tpu.memory_space<vmem>>, vector<8x128xf32>
    %108 = arith.truncf %101 : vector<8x32xf32> to vector<8x32xbf16>
    %cst_33 = arith.constant dense<0.000000e+00> : vector<8x128xf32>
    %109 = tpu.matmul %108, %19, %cst_33 {dimension_numbers = #tpu.dot_dimension_numbers<[1], [0], [0], [1], [0, 0, 1, 1], [], []>} : vector<8x32xbf16>, vector<32x128xbf16>, vector<8x128xf32> -> vector<8x128xf32>
    %110 = arith.addf %107, %109 : vector<8x128xf32>
    %111 = math.tanh %110 : vector<8x128xf32>
    %112 = arith.negf %110 : vector<8x128xf32>
    %113 = math.exp %112 : vector<8x128xf32>
    %cst_34 = arith.constant 1.000000e+00 : f32
    %114 = vector.broadcast %cst_34 : f32 to vector<8x128xf32>
    %115 = arith.addf %114, %113 : vector<8x128xf32>
    %116 = arith.divf %114, %115 : vector<8x128xf32>
    %117 = arith.select %13, %111, %116 : vector<8x128xi1>, vector<8x128xf32>
    %118 = vector.extract_strided_slice %117 {offsets = [0, 0], sizes = [8, 32], strides = [1, 1]} : vector<8x128xf32> to vector<8x32xf32>
    %119 = vector.extract_strided_slice %117 {offsets = [0, 32], sizes = [8, 32], strides = [1, 1]} : vector<8x128xf32> to vector<8x32xf32>
    %120 = vector.extract_strided_slice %117 {offsets = [0, 64], sizes = [8, 32], strides = [1, 1]} : vector<8x128xf32> to vector<8x32xf32>
    %121 = vector.extract_strided_slice %117 {offsets = [0, 96], sizes = [8, 32], strides = [1, 1]} : vector<8x128xf32> to vector<8x32xf32>
    %122 = arith.mulf %119, %99 : vector<8x32xf32>
    %123 = arith.mulf %118, %120 : vector<8x32xf32>
    %124 = arith.addf %122, %123 : vector<8x32xf32>
    %125 = math.tanh %124 : vector<8x32xf32>
    %126 = arith.mulf %121, %125 : vector<8x32xf32>
    %127 = arith.index_cast %105 : i32 to index
    %c0_35 = arith.constant 0 : index
    %128 = vector.load %arg9[%127, %c0_35] : memref<64x32xf32, #tpu.memory_space<vmem>>, vector<8x32xf32>
    tpu.vector_store %arg9[%127, %c0_35], %126 {strides = array<i32>} : memref<64x32xf32, #tpu.memory_space<vmem>>, vector<8x32xf32>,
    %c4_i32 = arith.constant 4 : i32
    %c8_i32_36 = arith.constant 8 : i32
    %129 = arith.muli %c4_i32, %c8_i32_36 : i32
    %130 = tpu.assume_multiple %129, 8 : i32
    %131 = arith.index_cast %130 : i32 to index
    %c0_37 = arith.constant 0 : index
    %132 = vector.load %arg8[%131, %c0_37] : memref<64x128xf32, #tpu.memory_space<vmem>>, vector<8x128xf32>
    %133 = arith.truncf %126 : vector<8x32xf32> to vector<8x32xbf16>
    %cst_38 = arith.constant dense<0.000000e+00> : vector<8x128xf32>
    %134 = tpu.matmul %133, %19, %cst_38 {dimension_numbers = #tpu.dot_dimension_numbers<[1], [0], [0], [1], [0, 0, 1, 1], [], []>} : vector<8x32xbf16>, vector<32x128xbf16>, vector<8x128xf32> -> vector<8x128xf32>
    %135 = arith.addf %132, %134 : vector<8x128xf32>
    %136 = math.tanh %135 : vector<8x128xf32>
    %137 = arith.negf %135 : vector<8x128xf32>
    %138 = math.exp %137 : vector<8x128xf32>
    %cst_39 = arith.constant 1.000000e+00 : f32
    %139 = vector.broadcast %cst_39 : f32 to vector<8x128xf32>
    %140 = arith.addf %139, %138 : vector<8x128xf32>
    %141 = arith.divf %139, %140 : vector<8x128xf32>
    %142 = arith.select %13, %136, %141 : vector<8x128xi1>, vector<8x128xf32>
    %143 = vector.extract_strided_slice %142 {offsets = [0, 0], sizes = [8, 32], strides = [1, 1]} : vector<8x128xf32> to vector<8x32xf32>
    %144 = vector.extract_strided_slice %142 {offsets = [0, 32], sizes = [8, 32], strides = [1, 1]} : vector<8x128xf32> to vector<8x32xf32>
    %145 = vector.extract_strided_slice %142 {offsets = [0, 64], sizes = [8, 32], strides = [1, 1]} : vector<8x128xf32> to vector<8x32xf32>
    %146 = vector.extract_strided_slice %142 {offsets = [0, 96], sizes = [8, 32], strides = [1, 1]} : vector<8x128xf32> to vector<8x32xf32>
    %147 = arith.mulf %144, %124 : vector<8x32xf32>
    %148 = arith.mulf %143, %145 : vector<8x32xf32>
    %149 = arith.addf %147, %148 : vector<8x32xf32>
    %150 = math.tanh %149 : vector<8x32xf32>
    %151 = arith.mulf %146, %150 : vector<8x32xf32>
    %152 = arith.index_cast %130 : i32 to index
    %c0_40 = arith.constant 0 : index
    %153 = vector.load %arg9[%152, %c0_40] : memref<64x32xf32, #tpu.memory_space<vmem>>, vector<8x32xf32>
    tpu.vector_store %arg9[%152, %c0_40], %151 {strides = array<i32>} : memref<64x32xf32, #tpu.memory_space<vmem>>, vector<8x32xf32>,
    %c5_i32 = arith.constant 5 : i32
    %c8_i32_41 = arith.constant 8 : i32
    %154 = arith.muli %c5_i32, %c8_i32_41 : i32
    %155 = tpu.assume_multiple %154, 8 : i32
    %156 = arith.index_cast %155 : i32 to index
    %c0_42 = arith.constant 0 : index
    %157 = vector.load %arg8[%156, %c0_42] : memref<64x128xf32, #tpu.memory_space<vmem>>, vector<8x128xf32>
    %158 = arith.truncf %151 : vector<8x32xf32> to vector<8x32xbf16>
    %cst_43 = arith.constant dense<0.000000e+00> : vector<8x128xf32>
    %159 = tpu.matmul %158, %19, %cst_43 {dimension_numbers = #tpu.dot_dimension_numbers<[1], [0], [0], [1], [0, 0, 1, 1], [], []>} : vector<8x32xbf16>, vector<32x128xbf16>, vector<8x128xf32> -> vector<8x128xf32>
    %160 = arith.addf %157, %159 : vector<8x128xf32>
    %161 = math.tanh %160 : vector<8x128xf32>
    %162 = arith.negf %160 : vector<8x128xf32>
    %163 = math.exp %162 : vector<8x128xf32>
    %cst_44 = arith.constant 1.000000e+00 : f32
    %164 = vector.broadcast %cst_44 : f32 to vector<8x128xf32>
    %165 = arith.addf %164, %163 : vector<8x128xf32>
    %166 = arith.divf %164, %165 : vector<8x128xf32>
    %167 = arith.select %13, %161, %166 : vector<8x128xi1>, vector<8x128xf32>
    %168 = vector.extract_strided_slice %167 {offsets = [0, 0], sizes = [8, 32], strides = [1, 1]} : vector<8x128xf32> to vector<8x32xf32>
    %169 = vector.extract_strided_slice %167 {offsets = [0, 32], sizes = [8, 32], strides = [1, 1]} : vector<8x128xf32> to vector<8x32xf32>
    %170 = vector.extract_strided_slice %167 {offsets = [0, 64], sizes = [8, 32], strides = [1, 1]} : vector<8x128xf32> to vector<8x32xf32>
    %171 = vector.extract_strided_slice %167 {offsets = [0, 96], sizes = [8, 32], strides = [1, 1]} : vector<8x128xf32> to vector<8x32xf32>
    %172 = arith.mulf %169, %149 : vector<8x32xf32>
    %173 = arith.mulf %168, %170 : vector<8x32xf32>
    %174 = arith.addf %172, %173 : vector<8x32xf32>
    %175 = math.tanh %174 : vector<8x32xf32>
    %176 = arith.mulf %171, %175 : vector<8x32xf32>
    %177 = arith.index_cast %155 : i32 to index
    %c0_45 = arith.constant 0 : index
    %178 = vector.load %arg9[%177, %c0_45] : memref<64x32xf32, #tpu.memory_space<vmem>>, vector<8x32xf32>
    tpu.vector_store %arg9[%177, %c0_45], %176 {strides = array<i32>} : memref<64x32xf32, #tpu.memory_space<vmem>>, vector<8x32xf32>,
    %c6_i32 = arith.constant 6 : i32
    %c8_i32_46 = arith.constant 8 : i32
    %179 = arith.muli %c6_i32, %c8_i32_46 : i32
    %180 = tpu.assume_multiple %179, 8 : i32
    %181 = arith.index_cast %180 : i32 to index
    %c0_47 = arith.constant 0 : index
    %182 = vector.load %arg8[%181, %c0_47] : memref<64x128xf32, #tpu.memory_space<vmem>>, vector<8x128xf32>
    %183 = arith.truncf %176 : vector<8x32xf32> to vector<8x32xbf16>
    %cst_48 = arith.constant dense<0.000000e+00> : vector<8x128xf32>
    %184 = tpu.matmul %183, %19, %cst_48 {dimension_numbers = #tpu.dot_dimension_numbers<[1], [0], [0], [1], [0, 0, 1, 1], [], []>} : vector<8x32xbf16>, vector<32x128xbf16>, vector<8x128xf32> -> vector<8x128xf32>
    %185 = arith.addf %182, %184 : vector<8x128xf32>
    %186 = math.tanh %185 : vector<8x128xf32>
    %187 = arith.negf %185 : vector<8x128xf32>
    %188 = math.exp %187 : vector<8x128xf32>
    %cst_49 = arith.constant 1.000000e+00 : f32
    %189 = vector.broadcast %cst_49 : f32 to vector<8x128xf32>
    %190 = arith.addf %189, %188 : vector<8x128xf32>
    %191 = arith.divf %189, %190 : vector<8x128xf32>
    %192 = arith.select %13, %186, %191 : vector<8x128xi1>, vector<8x128xf32>
    %193 = vector.extract_strided_slice %192 {offsets = [0, 0], sizes = [8, 32], strides = [1, 1]} : vector<8x128xf32> to vector<8x32xf32>
    %194 = vector.extract_strided_slice %192 {offsets = [0, 32], sizes = [8, 32], strides = [1, 1]} : vector<8x128xf32> to vector<8x32xf32>
    %195 = vector.extract_strided_slice %192 {offsets = [0, 64], sizes = [8, 32], strides = [1, 1]} : vector<8x128xf32> to vector<8x32xf32>
    %196 = vector.extract_strided_slice %192 {offsets = [0, 96], sizes = [8, 32], strides = [1, 1]} : vector<8x128xf32> to vector<8x32xf32>
    %197 = arith.mulf %194, %174 : vector<8x32xf32>
    %198 = arith.mulf %193, %195 : vector<8x32xf32>
    %199 = arith.addf %197, %198 : vector<8x32xf32>
    %200 = math.tanh %199 : vector<8x32xf32>
    %201 = arith.mulf %196, %200 : vector<8x32xf32>
    %202 = arith.index_cast %180 : i32 to index
    %c0_50 = arith.constant 0 : index
    %203 = vector.load %arg9[%202, %c0_50] : memref<64x32xf32, #tpu.memory_space<vmem>>, vector<8x32xf32>
    tpu.vector_store %arg9[%202, %c0_50], %201 {strides = array<i32>} : memref<64x32xf32, #tpu.memory_space<vmem>>, vector<8x32xf32>,
    %c7_i32 = arith.constant 7 : i32
    %c8_i32_51 = arith.constant 8 : i32
    %204 = arith.muli %c7_i32, %c8_i32_51 : i32
    %205 = tpu.assume_multiple %204, 8 : i32
    %206 = arith.index_cast %205 : i32 to index
    %c0_52 = arith.constant 0 : index
    %207 = vector.load %arg8[%206, %c0_52] : memref<64x128xf32, #tpu.memory_space<vmem>>, vector<8x128xf32>
    %208 = arith.truncf %201 : vector<8x32xf32> to vector<8x32xbf16>
    %cst_53 = arith.constant dense<0.000000e+00> : vector<8x128xf32>
    %209 = tpu.matmul %208, %19, %cst_53 {dimension_numbers = #tpu.dot_dimension_numbers<[1], [0], [0], [1], [0, 0, 1, 1], [], []>} : vector<8x32xbf16>, vector<32x128xbf16>, vector<8x128xf32> -> vector<8x128xf32>
    %210 = arith.addf %207, %209 : vector<8x128xf32>
    %211 = math.tanh %210 : vector<8x128xf32>
    %212 = arith.negf %210 : vector<8x128xf32>
    %213 = math.exp %212 : vector<8x128xf32>
    %cst_54 = arith.constant 1.000000e+00 : f32
    %214 = vector.broadcast %cst_54 : f32 to vector<8x128xf32>
    %215 = arith.addf %214, %213 : vector<8x128xf32>
    %216 = arith.divf %214, %215 : vector<8x128xf32>
    %217 = arith.select %13, %211, %216 : vector<8x128xi1>, vector<8x128xf32>
    %218 = vector.extract_strided_slice %217 {offsets = [0, 0], sizes = [8, 32], strides = [1, 1]} : vector<8x128xf32> to vector<8x32xf32>
    %219 = vector.extract_strided_slice %217 {offsets = [0, 32], sizes = [8, 32], strides = [1, 1]} : vector<8x128xf32> to vector<8x32xf32>
    %220 = vector.extract_strided_slice %217 {offsets = [0, 64], sizes = [8, 32], strides = [1, 1]} : vector<8x128xf32> to vector<8x32xf32>
    %221 = vector.extract_strided_slice %217 {offsets = [0, 96], sizes = [8, 32], strides = [1, 1]} : vector<8x128xf32> to vector<8x32xf32>
    %222 = arith.mulf %219, %199 : vector<8x32xf32>
    %223 = arith.mulf %218, %220 : vector<8x32xf32>
    %224 = arith.addf %222, %223 : vector<8x32xf32>
    %225 = math.tanh %224 : vector<8x32xf32>
    %226 = arith.mulf %221, %225 : vector<8x32xf32>
    %227 = arith.index_cast %205 : i32 to index
    %c0_55 = arith.constant 0 : index
    %228 = vector.load %arg9[%227, %c0_55] : memref<64x32xf32, #tpu.memory_space<vmem>>, vector<8x32xf32>
    tpu.vector_store %arg9[%227, %c0_55], %226 {strides = array<i32>} : memref<64x32xf32, #tpu.memory_space<vmem>>, vector<8x32xf32>,
    %c8_i32_56 = arith.constant 8 : i32
    %c0_57 = arith.constant 0 : index
    %c0_58 = arith.constant 0 : index
    %229 = vector.load %arg9[%c0_57, %c0_58] : memref<64x32xf32, #tpu.memory_space<vmem>>, vector<64x32xf32>
    %c1 = arith.constant 1 : index
    %c0_59 = arith.constant 0 : index
    %c0_60 = arith.constant 0 : index
    %230 = vector.load %arg2[%c1, %c0_59, %c0_60] : memref<2x32x128xf32, #tpu.memory_space<vmem>>, vector<1x32x128xf32>
    %231 = vector.shape_cast %230 : vector<1x32x128xf32> to vector<32x128xf32>
    %232 = arith.truncf %231 : vector<32x128xf32> to vector<32x128xbf16>
    %c1_61 = arith.constant 1 : index
    %c0_62 = arith.constant 0 : index
    %c0_63 = arith.constant 0 : index
    %233 = vector.load %arg3[%c1_61, %c0_62, %c0_63] : memref<2x32x128xf32, #tpu.memory_space<vmem>>, vector<1x32x128xf32>
    %234 = vector.shape_cast %233 : vector<1x32x128xf32> to vector<32x128xf32>
    %235 = arith.truncf %234 : vector<32x128xf32> to vector<32x128xbf16>
    %236 = arith.truncf %229 : vector<64x32xf32> to vector<64x32xbf16>
    %cst_64 = arith.constant dense<0.000000e+00> : vector<64x128xf32>
    %237 = tpu.matmul %236, %232, %cst_64 {dimension_numbers = #tpu.dot_dimension_numbers<[1], [0], [0], [1], [0, 0, 1, 1], [], []>} : vector<64x32xbf16>, vector<32x128xbf16>, vector<64x128xf32> -> vector<64x128xf32>
    %c1_65 = arith.constant 1 : index
    %c0_66 = arith.constant 0 : index
    %c0_67 = arith.constant 0 : index
    %238 = vector.load %arg4[%c1_65, %c0_66, %c0_67] : memref<2x1x128xf32, #tpu.memory_space<vmem>>, vector<1x1x128xf32>
    %239 = vector.shape_cast %238 : vector<1x1x128xf32> to vector<1x128xf32>
    %240 = vector.broadcast %239 : vector<1x128xf32> to vector<64x128xf32>
    %241 = arith.addf %237, %240 : vector<64x128xf32>
    %c0_68 = arith.constant 0 : index
    %c0_69 = arith.constant 0 : index
    %242 = vector.load %arg8[%c0_68, %c0_69] : memref<64x128xf32, #tpu.memory_space<vmem>>, vector<64x128xf32>
    tpu.vector_store %arg8[%c0_68, %c0_69], %241 {strides = array<i32>} : memref<64x128xf32, #tpu.memory_space<vmem>>, vector<64x128xf32>,
    %cst_70 = arith.constant 0.000000e+00 : f32
    %243 = vector.broadcast %cst_70 : f32 to vector<8x32xf32>
    %cst_71 = arith.constant 0.000000e+00 : f32
    %244 = vector.broadcast %cst_71 : f32 to vector<8x32xf32>
    %c0_i32_72 = arith.constant 0 : i32
    %c8_i32_73 = arith.constant 8 : i32
    %245 = arith.muli %c0_i32_72, %c8_i32_73 : i32
    %246 = tpu.assume_multiple %245, 8 : i32
    %247 = arith.index_cast %246 : i32 to index
    %c0_74 = arith.constant 0 : index
    %248 = vector.load %arg8[%247, %c0_74] : memref<64x128xf32, #tpu.memory_space<vmem>>, vector<8x128xf32>
    %249 = arith.truncf %243 : vector<8x32xf32> to vector<8x32xbf16>
    %cst_75 = arith.constant dense<0.000000e+00> : vector<8x128xf32>
    %250 = tpu.matmul %249, %235, %cst_75 {dimension_numbers = #tpu.dot_dimension_numbers<[1], [0], [0], [1], [0, 0, 1, 1], [], []>} : vector<8x32xbf16>, vector<32x128xbf16>, vector<8x128xf32> -> vector<8x128xf32>
    %251 = arith.addf %248, %250 : vector<8x128xf32>
    %252 = math.tanh %251 : vector<8x128xf32>
    %253 = arith.negf %251 : vector<8x128xf32>
    %254 = math.exp %253 : vector<8x128xf32>
    %cst_76 = arith.constant 1.000000e+00 : f32
    %255 = vector.broadcast %cst_76 : f32 to vector<8x128xf32>
    %256 = arith.addf %255, %254 : vector<8x128xf32>
    %257 = arith.divf %255, %256 : vector<8x128xf32>
    %258 = arith.select %13, %252, %257 : vector<8x128xi1>, vector<8x128xf32>
    %259 = vector.extract_strided_slice %258 {offsets = [0, 0], sizes = [8, 32], strides = [1, 1]} : vector<8x128xf32> to vector<8x32xf32>
    %260 = vector.extract_strided_slice %258 {offsets = [0, 32], sizes = [8, 32], strides = [1, 1]} : vector<8x128xf32> to vector<8x32xf32>
    %261 = vector.extract_strided_slice %258 {offsets = [0, 64], sizes = [8, 32], strides = [1, 1]} : vector<8x128xf32> to vector<8x32xf32>
    %262 = vector.extract_strided_slice %258 {offsets = [0, 96], sizes = [8, 32], strides = [1, 1]} : vector<8x128xf32> to vector<8x32xf32>
    %263 = arith.mulf %260, %244 : vector<8x32xf32>
    %264 = arith.mulf %259, %261 : vector<8x32xf32>
    %265 = arith.addf %263, %264 : vector<8x32xf32>
    %266 = math.tanh %265 : vector<8x32xf32>
    %267 = arith.mulf %262, %266 : vector<8x32xf32>
    %268 = arith.index_cast %246 : i32 to index
    %c0_77 = arith.constant 0 : index
    %269 = vector.load %arg9[%268, %c0_77] : memref<64x32xf32, #tpu.memory_space<vmem>>, vector<8x32xf32>
    tpu.vector_store %arg9[%268, %c0_77], %267 {strides = array<i32>} : memref<64x32xf32, #tpu.memory_space<vmem>>, vector<8x32xf32>,
    %c1_i32_78 = arith.constant 1 : i32
    %c8_i32_79 = arith.constant 8 : i32
    %270 = arith.muli %c1_i32_78, %c8_i32_79 : i32
    %271 = tpu.assume_multiple %270, 8 : i32
    %272 = arith.index_cast %271 : i32 to index
    %c0_80 = arith.constant 0 : index
    %273 = vector.load %arg8[%272, %c0_80] : memref<64x128xf32, #tpu.memory_space<vmem>>, vector<8x128xf32>
    %274 = arith.truncf %267 : vector<8x32xf32> to vector<8x32xbf16>
    %cst_81 = arith.constant dense<0.000000e+00> : vector<8x128xf32>
    %275 = tpu.matmul %274, %235, %cst_81 {dimension_numbers = #tpu.dot_dimension_numbers<[1], [0], [0], [1], [0, 0, 1, 1], [], []>} : vector<8x32xbf16>, vector<32x128xbf16>, vector<8x128xf32> -> vector<8x128xf32>
    %276 = arith.addf %273, %275 : vector<8x128xf32>
    %277 = math.tanh %276 : vector<8x128xf32>
    %278 = arith.negf %276 : vector<8x128xf32>
    %279 = math.exp %278 : vector<8x128xf32>
    %cst_82 = arith.constant 1.000000e+00 : f32
    %280 = vector.broadcast %cst_82 : f32 to vector<8x128xf32>
    %281 = arith.addf %280, %279 : vector<8x128xf32>
    %282 = arith.divf %280, %281 : vector<8x128xf32>
    %283 = arith.select %13, %277, %282 : vector<8x128xi1>, vector<8x128xf32>
    %284 = vector.extract_strided_slice %283 {offsets = [0, 0], sizes = [8, 32], strides = [1, 1]} : vector<8x128xf32> to vector<8x32xf32>
    %285 = vector.extract_strided_slice %283 {offsets = [0, 32], sizes = [8, 32], strides = [1, 1]} : vector<8x128xf32> to vector<8x32xf32>
    %286 = vector.extract_strided_slice %283 {offsets = [0, 64], sizes = [8, 32], strides = [1, 1]} : vector<8x128xf32> to vector<8x32xf32>
    %287 = vector.extract_strided_slice %283 {offsets = [0, 96], sizes = [8, 32], strides = [1, 1]} : vector<8x128xf32> to vector<8x32xf32>
    %288 = arith.mulf %285, %265 : vector<8x32xf32>
    %289 = arith.mulf %284, %286 : vector<8x32xf32>
    %290 = arith.addf %288, %289 : vector<8x32xf32>
    %291 = math.tanh %290 : vector<8x32xf32>
    %292 = arith.mulf %287, %291 : vector<8x32xf32>
    %293 = arith.index_cast %271 : i32 to index
    %c0_83 = arith.constant 0 : index
    %294 = vector.load %arg9[%293, %c0_83] : memref<64x32xf32, #tpu.memory_space<vmem>>, vector<8x32xf32>
    tpu.vector_store %arg9[%293, %c0_83], %292 {strides = array<i32>} : memref<64x32xf32, #tpu.memory_space<vmem>>, vector<8x32xf32>,
    %c2_i32_84 = arith.constant 2 : i32
    %c8_i32_85 = arith.constant 8 : i32
    %295 = arith.muli %c2_i32_84, %c8_i32_85 : i32
    %296 = tpu.assume_multiple %295, 8 : i32
    %297 = arith.index_cast %296 : i32 to index
    %c0_86 = arith.constant 0 : index
    %298 = vector.load %arg8[%297, %c0_86] : memref<64x128xf32, #tpu.memory_space<vmem>>, vector<8x128xf32>
    %299 = arith.truncf %292 : vector<8x32xf32> to vector<8x32xbf16>
    %cst_87 = arith.constant dense<0.000000e+00> : vector<8x128xf32>
    %300 = tpu.matmul %299, %235, %cst_87 {dimension_numbers = #tpu.dot_dimension_numbers<[1], [0], [0], [1], [0, 0, 1, 1], [], []>} : vector<8x32xbf16>, vector<32x128xbf16>, vector<8x128xf32> -> vector<8x128xf32>
    %301 = arith.addf %298, %300 : vector<8x128xf32>
    %302 = math.tanh %301 : vector<8x128xf32>
    %303 = arith.negf %301 : vector<8x128xf32>
    %304 = math.exp %303 : vector<8x128xf32>
    %cst_88 = arith.constant 1.000000e+00 : f32
    %305 = vector.broadcast %cst_88 : f32 to vector<8x128xf32>
    %306 = arith.addf %305, %304 : vector<8x128xf32>
    %307 = arith.divf %305, %306 : vector<8x128xf32>
    %308 = arith.select %13, %302, %307 : vector<8x128xi1>, vector<8x128xf32>
    %309 = vector.extract_strided_slice %308 {offsets = [0, 0], sizes = [8, 32], strides = [1, 1]} : vector<8x128xf32> to vector<8x32xf32>
    %310 = vector.extract_strided_slice %308 {offsets = [0, 32], sizes = [8, 32], strides = [1, 1]} : vector<8x128xf32> to vector<8x32xf32>
    %311 = vector.extract_strided_slice %308 {offsets = [0, 64], sizes = [8, 32], strides = [1, 1]} : vector<8x128xf32> to vector<8x32xf32>
    %312 = vector.extract_strided_slice %308 {offsets = [0, 96], sizes = [8, 32], strides = [1, 1]} : vector<8x128xf32> to vector<8x32xf32>
    %313 = arith.mulf %310, %290 : vector<8x32xf32>
    %314 = arith.mulf %309, %311 : vector<8x32xf32>
    %315 = arith.addf %313, %314 : vector<8x32xf32>
    %316 = math.tanh %315 : vector<8x32xf32>
    %317 = arith.mulf %312, %316 : vector<8x32xf32>
    %318 = arith.index_cast %296 : i32 to index
    %c0_89 = arith.constant 0 : index
    %319 = vector.load %arg9[%318, %c0_89] : memref<64x32xf32, #tpu.memory_space<vmem>>, vector<8x32xf32>
    tpu.vector_store %arg9[%318, %c0_89], %317 {strides = array<i32>} : memref<64x32xf32, #tpu.memory_space<vmem>>, vector<8x32xf32>,
    %c3_i32_90 = arith.constant 3 : i32
    %c8_i32_91 = arith.constant 8 : i32
    %320 = arith.muli %c3_i32_90, %c8_i32_91 : i32
    %321 = tpu.assume_multiple %320, 8 : i32
    %322 = arith.index_cast %321 : i32 to index
    %c0_92 = arith.constant 0 : index
    %323 = vector.load %arg8[%322, %c0_92] : memref<64x128xf32, #tpu.memory_space<vmem>>, vector<8x128xf32>
    %324 = arith.truncf %317 : vector<8x32xf32> to vector<8x32xbf16>
    %cst_93 = arith.constant dense<0.000000e+00> : vector<8x128xf32>
    %325 = tpu.matmul %324, %235, %cst_93 {dimension_numbers = #tpu.dot_dimension_numbers<[1], [0], [0], [1], [0, 0, 1, 1], [], []>} : vector<8x32xbf16>, vector<32x128xbf16>, vector<8x128xf32> -> vector<8x128xf32>
    %326 = arith.addf %323, %325 : vector<8x128xf32>
    %327 = math.tanh %326 : vector<8x128xf32>
    %328 = arith.negf %326 : vector<8x128xf32>
    %329 = math.exp %328 : vector<8x128xf32>
    %cst_94 = arith.constant 1.000000e+00 : f32
    %330 = vector.broadcast %cst_94 : f32 to vector<8x128xf32>
    %331 = arith.addf %330, %329 : vector<8x128xf32>
    %332 = arith.divf %330, %331 : vector<8x128xf32>
    %333 = arith.select %13, %327, %332 : vector<8x128xi1>, vector<8x128xf32>
    %334 = vector.extract_strided_slice %333 {offsets = [0, 0], sizes = [8, 32], strides = [1, 1]} : vector<8x128xf32> to vector<8x32xf32>
    %335 = vector.extract_strided_slice %333 {offsets = [0, 32], sizes = [8, 32], strides = [1, 1]} : vector<8x128xf32> to vector<8x32xf32>
    %336 = vector.extract_strided_slice %333 {offsets = [0, 64], sizes = [8, 32], strides = [1, 1]} : vector<8x128xf32> to vector<8x32xf32>
    %337 = vector.extract_strided_slice %333 {offsets = [0, 96], sizes = [8, 32], strides = [1, 1]} : vector<8x128xf32> to vector<8x32xf32>
    %338 = arith.mulf %335, %315 : vector<8x32xf32>
    %339 = arith.mulf %334, %336 : vector<8x32xf32>
    %340 = arith.addf %338, %339 : vector<8x32xf32>
    %341 = math.tanh %340 : vector<8x32xf32>
    %342 = arith.mulf %337, %341 : vector<8x32xf32>
    %343 = arith.index_cast %321 : i32 to index
    %c0_95 = arith.constant 0 : index
    %344 = vector.load %arg9[%343, %c0_95] : memref<64x32xf32, #tpu.memory_space<vmem>>, vector<8x32xf32>
    tpu.vector_store %arg9[%343, %c0_95], %342 {strides = array<i32>} : memref<64x32xf32, #tpu.memory_space<vmem>>, vector<8x32xf32>,
    %c4_i32_96 = arith.constant 4 : i32
    %c8_i32_97 = arith.constant 8 : i32
    %345 = arith.muli %c4_i32_96, %c8_i32_97 : i32
    %346 = tpu.assume_multiple %345, 8 : i32
    %347 = arith.index_cast %346 : i32 to index
    %c0_98 = arith.constant 0 : index
    %348 = vector.load %arg8[%347, %c0_98] : memref<64x128xf32, #tpu.memory_space<vmem>>, vector<8x128xf32>
    %349 = arith.truncf %342 : vector<8x32xf32> to vector<8x32xbf16>
    %cst_99 = arith.constant dense<0.000000e+00> : vector<8x128xf32>
    %350 = tpu.matmul %349, %235, %cst_99 {dimension_numbers = #tpu.dot_dimension_numbers<[1], [0], [0], [1], [0, 0, 1, 1], [], []>} : vector<8x32xbf16>, vector<32x128xbf16>, vector<8x128xf32> -> vector<8x128xf32>
    %351 = arith.addf %348, %350 : vector<8x128xf32>
    %352 = math.tanh %351 : vector<8x128xf32>
    %353 = arith.negf %351 : vector<8x128xf32>
    %354 = math.exp %353 : vector<8x128xf32>
    %cst_100 = arith.constant 1.000000e+00 : f32
    %355 = vector.broadcast %cst_100 : f32 to vector<8x128xf32>
    %356 = arith.addf %355, %354 : vector<8x128xf32>
    %357 = arith.divf %355, %356 : vector<8x128xf32>
    %358 = arith.select %13, %352, %357 : vector<8x128xi1>, vector<8x128xf32>
    %359 = vector.extract_strided_slice %358 {offsets = [0, 0], sizes = [8, 32], strides = [1, 1]} : vector<8x128xf32> to vector<8x32xf32>
    %360 = vector.extract_strided_slice %358 {offsets = [0, 32], sizes = [8, 32], strides = [1, 1]} : vector<8x128xf32> to vector<8x32xf32>
    %361 = vector.extract_strided_slice %358 {offsets = [0, 64], sizes = [8, 32], strides = [1, 1]} : vector<8x128xf32> to vector<8x32xf32>
    %362 = vector.extract_strided_slice %358 {offsets = [0, 96], sizes = [8, 32], strides = [1, 1]} : vector<8x128xf32> to vector<8x32xf32>
    %363 = arith.mulf %360, %340 : vector<8x32xf32>
    %364 = arith.mulf %359, %361 : vector<8x32xf32>
    %365 = arith.addf %363, %364 : vector<8x32xf32>
    %366 = math.tanh %365 : vector<8x32xf32>
    %367 = arith.mulf %362, %366 : vector<8x32xf32>
    %368 = arith.index_cast %346 : i32 to index
    %c0_101 = arith.constant 0 : index
    %369 = vector.load %arg9[%368, %c0_101] : memref<64x32xf32, #tpu.memory_space<vmem>>, vector<8x32xf32>
    tpu.vector_store %arg9[%368, %c0_101], %367 {strides = array<i32>} : memref<64x32xf32, #tpu.memory_space<vmem>>, vector<8x32xf32>,
    %c5_i32_102 = arith.constant 5 : i32
    %c8_i32_103 = arith.constant 8 : i32
    %370 = arith.muli %c5_i32_102, %c8_i32_103 : i32
    %371 = tpu.assume_multiple %370, 8 : i32
    %372 = arith.index_cast %371 : i32 to index
    %c0_104 = arith.constant 0 : index
    %373 = vector.load %arg8[%372, %c0_104] : memref<64x128xf32, #tpu.memory_space<vmem>>, vector<8x128xf32>
    %374 = arith.truncf %367 : vector<8x32xf32> to vector<8x32xbf16>
    %cst_105 = arith.constant dense<0.000000e+00> : vector<8x128xf32>
    %375 = tpu.matmul %374, %235, %cst_105 {dimension_numbers = #tpu.dot_dimension_numbers<[1], [0], [0], [1], [0, 0, 1, 1], [], []>} : vector<8x32xbf16>, vector<32x128xbf16>, vector<8x128xf32> -> vector<8x128xf32>
    %376 = arith.addf %373, %375 : vector<8x128xf32>
    %377 = math.tanh %376 : vector<8x128xf32>
    %378 = arith.negf %376 : vector<8x128xf32>
    %379 = math.exp %378 : vector<8x128xf32>
    %cst_106 = arith.constant 1.000000e+00 : f32
    %380 = vector.broadcast %cst_106 : f32 to vector<8x128xf32>
    %381 = arith.addf %380, %379 : vector<8x128xf32>
    %382 = arith.divf %380, %381 : vector<8x128xf32>
    %383 = arith.select %13, %377, %382 : vector<8x128xi1>, vector<8x128xf32>
    %384 = vector.extract_strided_slice %383 {offsets = [0, 0], sizes = [8, 32], strides = [1, 1]} : vector<8x128xf32> to vector<8x32xf32>
    %385 = vector.extract_strided_slice %383 {offsets = [0, 32], sizes = [8, 32], strides = [1, 1]} : vector<8x128xf32> to vector<8x32xf32>
    %386 = vector.extract_strided_slice %383 {offsets = [0, 64], sizes = [8, 32], strides = [1, 1]} : vector<8x128xf32> to vector<8x32xf32>
    %387 = vector.extract_strided_slice %383 {offsets = [0, 96], sizes = [8, 32], strides = [1, 1]} : vector<8x128xf32> to vector<8x32xf32>
    %388 = arith.mulf %385, %365 : vector<8x32xf32>
    %389 = arith.mulf %384, %386 : vector<8x32xf32>
    %390 = arith.addf %388, %389 : vector<8x32xf32>
    %391 = math.tanh %390 : vector<8x32xf32>
    %392 = arith.mulf %387, %391 : vector<8x32xf32>
    %393 = arith.index_cast %371 : i32 to index
    %c0_107 = arith.constant 0 : index
    %394 = vector.load %arg9[%393, %c0_107] : memref<64x32xf32, #tpu.memory_space<vmem>>, vector<8x32xf32>
    tpu.vector_store %arg9[%393, %c0_107], %392 {strides = array<i32>} : memref<64x32xf32, #tpu.memory_space<vmem>>, vector<8x32xf32>,
    %c6_i32_108 = arith.constant 6 : i32
    %c8_i32_109 = arith.constant 8 : i32
    %395 = arith.muli %c6_i32_108, %c8_i32_109 : i32
    %396 = tpu.assume_multiple %395, 8 : i32
    %397 = arith.index_cast %396 : i32 to index
    %c0_110 = arith.constant 0 : index
    %398 = vector.load %arg8[%397, %c0_110] : memref<64x128xf32, #tpu.memory_space<vmem>>, vector<8x128xf32>
    %399 = arith.truncf %392 : vector<8x32xf32> to vector<8x32xbf16>
    %cst_111 = arith.constant dense<0.000000e+00> : vector<8x128xf32>
    %400 = tpu.matmul %399, %235, %cst_111 {dimension_numbers = #tpu.dot_dimension_numbers<[1], [0], [0], [1], [0, 0, 1, 1], [], []>} : vector<8x32xbf16>, vector<32x128xbf16>, vector<8x128xf32> -> vector<8x128xf32>
    %401 = arith.addf %398, %400 : vector<8x128xf32>
    %402 = math.tanh %401 : vector<8x128xf32>
    %403 = arith.negf %401 : vector<8x128xf32>
    %404 = math.exp %403 : vector<8x128xf32>
    %cst_112 = arith.constant 1.000000e+00 : f32
    %405 = vector.broadcast %cst_112 : f32 to vector<8x128xf32>
    %406 = arith.addf %405, %404 : vector<8x128xf32>
    %407 = arith.divf %405, %406 : vector<8x128xf32>
    %408 = arith.select %13, %402, %407 : vector<8x128xi1>, vector<8x128xf32>
    %409 = vector.extract_strided_slice %408 {offsets = [0, 0], sizes = [8, 32], strides = [1, 1]} : vector<8x128xf32> to vector<8x32xf32>
    %410 = vector.extract_strided_slice %408 {offsets = [0, 32], sizes = [8, 32], strides = [1, 1]} : vector<8x128xf32> to vector<8x32xf32>
    %411 = vector.extract_strided_slice %408 {offsets = [0, 64], sizes = [8, 32], strides = [1, 1]} : vector<8x128xf32> to vector<8x32xf32>
    %412 = vector.extract_strided_slice %408 {offsets = [0, 96], sizes = [8, 32], strides = [1, 1]} : vector<8x128xf32> to vector<8x32xf32>
    %413 = arith.mulf %410, %390 : vector<8x32xf32>
    %414 = arith.mulf %409, %411 : vector<8x32xf32>
    %415 = arith.addf %413, %414 : vector<8x32xf32>
    %416 = math.tanh %415 : vector<8x32xf32>
    %417 = arith.mulf %412, %416 : vector<8x32xf32>
    %418 = arith.index_cast %396 : i32 to index
    %c0_113 = arith.constant 0 : index
    %419 = vector.load %arg9[%418, %c0_113] : memref<64x32xf32, #tpu.memory_space<vmem>>, vector<8x32xf32>
    tpu.vector_store %arg9[%418, %c0_113], %417 {strides = array<i32>} : memref<64x32xf32, #tpu.memory_space<vmem>>, vector<8x32xf32>,
    %c7_i32_114 = arith.constant 7 : i32
    %c8_i32_115 = arith.constant 8 : i32
    %420 = arith.muli %c7_i32_114, %c8_i32_115 : i32
    %421 = tpu.assume_multiple %420, 8 : i32
    %422 = arith.index_cast %421 : i32 to index
    %c0_116 = arith.constant 0 : index
    %423 = vector.load %arg8[%422, %c0_116] : memref<64x128xf32, #tpu.memory_space<vmem>>, vector<8x128xf32>
    %424 = arith.truncf %417 : vector<8x32xf32> to vector<8x32xbf16>
    %cst_117 = arith.constant dense<0.000000e+00> : vector<8x128xf32>
    %425 = tpu.matmul %424, %235, %cst_117 {dimension_numbers = #tpu.dot_dimension_numbers<[1], [0], [0], [1], [0, 0, 1, 1], [], []>} : vector<8x32xbf16>, vector<32x128xbf16>, vector<8x128xf32> -> vector<8x128xf32>
    %426 = arith.addf %423, %425 : vector<8x128xf32>
    %427 = math.tanh %426 : vector<8x128xf32>
    %428 = arith.negf %426 : vector<8x128xf32>
    %429 = math.exp %428 : vector<8x128xf32>
    %cst_118 = arith.constant 1.000000e+00 : f32
    %430 = vector.broadcast %cst_118 : f32 to vector<8x128xf32>
    %431 = arith.addf %430, %429 : vector<8x128xf32>
    %432 = arith.divf %430, %431 : vector<8x128xf32>
    %433 = arith.select %13, %427, %432 : vector<8x128xi1>, vector<8x128xf32>
    %434 = vector.extract_strided_slice %433 {offsets = [0, 0], sizes = [8, 32], strides = [1, 1]} : vector<8x128xf32> to vector<8x32xf32>
    %435 = vector.extract_strided_slice %433 {offsets = [0, 32], sizes = [8, 32], strides = [1, 1]} : vector<8x128xf32> to vector<8x32xf32>
    %436 = vector.extract_strided_slice %433 {offsets = [0, 64], sizes = [8, 32], strides = [1, 1]} : vector<8x128xf32> to vector<8x32xf32>
    %437 = vector.extract_strided_slice %433 {offsets = [0, 96], sizes = [8, 32], strides = [1, 1]} : vector<8x128xf32> to vector<8x32xf32>
    %438 = arith.mulf %435, %415 : vector<8x32xf32>
    %439 = arith.mulf %434, %436 : vector<8x32xf32>
    %440 = arith.addf %438, %439 : vector<8x32xf32>
    %441 = math.tanh %440 : vector<8x32xf32>
    %442 = arith.mulf %437, %441 : vector<8x32xf32>
    %443 = arith.index_cast %421 : i32 to index
    %c0_119 = arith.constant 0 : index
    %444 = vector.load %arg9[%443, %c0_119] : memref<64x32xf32, #tpu.memory_space<vmem>>, vector<8x32xf32>
    tpu.vector_store %arg9[%443, %c0_119], %442 {strides = array<i32>} : memref<64x32xf32, #tpu.memory_space<vmem>>, vector<8x32xf32>,
    %c8_i32_120 = arith.constant 8 : i32
    %c0_121 = arith.constant 0 : index
    %c0_122 = arith.constant 0 : index
    %445 = vector.load %arg5[%c0_121, %c0_122] : memref<1x32xf32, #tpu.memory_space<vmem>>, vector<1x32xf32>
    %446 = vector.broadcast %445 : vector<1x32xf32> to vector<8x32xf32>
    %447 = arith.mulf %442, %446 : vector<8x32xf32>
    %cst_123 = arith.constant dense<0.000000e+00> : vector<8xf32>
    %448 = vector.multi_reduction <add>, %447, %cst_123 [1] : vector<8x32xf32> to vector<8xf32>
    %449 = vector.shape_cast %448 : vector<8xf32> to vector<8x1xf32>
    %c0_124 = arith.constant 0 : index
    %c0_125 = arith.constant 0 : index
    %450 = vector.load %arg6[%c0_124, %c0_125] : memref<1x1xf32, #tpu.memory_space<vmem>>, vector<1x1xf32>
    %451 = vector.broadcast %450 : vector<1x1xf32> to vector<8x1xf32>
    %452 = arith.addf %449, %451 : vector<8x1xf32>
    %453 = arith.negf %452 : vector<8x1xf32>
    %454 = math.exp %453 : vector<8x1xf32>
    %cst_126 = arith.constant 1.000000e+00 : f32
    %455 = vector.broadcast %cst_126 : f32 to vector<8x1xf32>
    %456 = arith.addf %455, %454 : vector<8x1xf32>
    %457 = arith.divf %455, %456 : vector<8x1xf32>
    %c0_127 = arith.constant 0 : index
    %c0_128 = arith.constant 0 : index
    %458 = vector.load %arg7[%c0_127, %c0_128] : memref<8x1xf32, #tpu.memory_space<vmem>>, vector<8x1xf32>
    tpu.vector_store %arg7[%c0_127, %c0_128], %457 {strides = array<i32>} : memref<8x1xf32, #tpu.memory_space<vmem>>, vector<8x1xf32>,
    return
  }
}

</mosaic_0001>

<bundles_post_ra>
// kernel: tpu_custom_call.1
= control target key start
LH: loop header
LB: loop body
LE: loop exit
PB: predicated region body
PF: predicated region fallthrough
CT: control target
= control target key end

     0   :  { %v1609_v0 = vmov 0   ;;  %v29_v17 = vlaneseq  ;;  %vm94_vm0 = vcmask 457728   ;;  %v1610_v20 = vmov 0.0   ;;  %s1611_s15 = smov 64   ;;  %s1612_s16 = smov 32   ;;  %s2098_s0 = inlined_call_operand.vmem [shape: s32[64,1], index: 0, kind: input, shape index: {}]   ;;  %s2099_s1 = inlined_call_operand.vmem [shape: f32[56,32], index: 1, kind: input, shape index: {}]   ;;  %s2100_s3 = inlined_call_operand.vmem [shape: f32[2,32,128], index: 3, kind: input, shape index: {}]   ;;  %s2101_s4 = inlined_call_operand.vmem [shape: f32[2,1,128], index: 4, kind: input, shape index: {}]   ;;  %s2102_s2 = inlined_call_operand.vmem [shape: f32[2,32,128], index: 2, kind: input, shape index: {}]   ;;  %s2103_s5 = inlined_call_operand.vmem [shape: f32[1,32], index: 5, kind: input, shape index: {}]   ;;  %s2104_s6 = inlined_call_operand.<no memory space> [shape: f32[1,1], index: 6, kind: input, shape index: {}]   ;;  %s2105_s7 = inlined_call_operand.vmem [shape: f32[8,1], index: 7, kind: output, shape index: {}]  }
   0x1   :  { %1469 = vset.pattern.permute.xlu0 %v1609_v0  ;;  %v31_v1 = vld [vmem:[%s2098_s0] sm:$0xff]  ;;  %1470 = vset.pattern.permute.xlu2 %v1609_v0  ;;  %v93_v2 = vld [vmem:[%s2099_s1 + $0x30] sm:$0xff]  ;;  %v92_v3 = vld [vmem:[%s2099_s1 + $0x28] sm:$0xff]  ;;  %vm183_vm4 = vcmask 261120   ;;  %s1613_s23 = smov 96  }
   0x2   :  { %40 = vperm.xlu0 %1469, %v31_v1   ;;  %1471 = vset.pattern.permute.xlu1 %v1609_v0  ;;  %v91_v4 = vld [vmem:[%s2099_s1 + $0x20] sm:$0xff]  ;;  %v90_v5 = vld [vmem:[%s2099_s1 + $0x18] sm:$0xff]  ;;  %v32_v6 = vld [vmem:[%s2098_s0 + $0x8] sm:$0xff]  ;;  %v1709_v18 = vand.u32 127, %v29_v17 }
   0x3   :  { %128 = vmatpush.msra.mxu0 %v93_v2  ;;  %v89_v7 = vld [vmem:[%s2099_s1 + $0x10] sm:$0xff]  ;;  %v88_v8 = vld [vmem:[%s2099_s1 + $0x8] sm:$0xff]  ;;  %v87_v10 = vld [vmem:[%s2099_s1] sm:$0xff] }
   0x4   :  { %v33_v9 = vld [vmem:[%s2098_s0 + $0x10] sm:$0xff]  ;;  %v172_v12 = vld [vmem:[%s2100_s3 + $0x18] sm:$0xff]  ;;  %v169_v13 = vld [vmem:[%s2100_s3] sm:$0xff]  ;;  %vm160_vm5 = vcmp.ge.s32.totalorder %v1709_v18, 64  ;;  %vm161_vm6 = vcmp.lt.s32.totalorder %v1709_v18, 96 }
   0x5   :  { %129 = vmatpush.msra.mxu0 %v92_v3  ;;  %v171_v11 = vld [vmem:[%s2100_s3 + $0x10] sm:$0xff]  ;;  %v170_v15 = vld [vmem:[%s2100_s3 + $0x8] sm:$0xff]  ;;  %v166_v27 = vld [vmem:[%s2102_s2 + $0x18] sm:$0xff] }
   0x6   :  { %v1696_v14 = vpack.c.bf16 %v172_v12, %v171_v11  ;;  %v1702_v16 = vpack.c.bf16 %v170_v15, %v169_v13  ;;  %v165_v26 = vld [vmem:[%s2102_s2 + $0x10] sm:$0xff]  ;;  %v163_v29 = vld [vmem:[%s2102_s2] sm:$0xff]  ;;  %v164_v30 = vld [vmem:[%s2102_s2 + $0x8] sm:$0xff] }
   0x7   :  { %130 = vmatpush.msra.mxu0 %v91_v4  ;;  %v168_v28 = vpack.c.bf16 %v166_v27, %v165_v26  ;;  %v167_v31 = vpack.c.bf16 %v164_v30, %v163_v29  ;;  %v1741_v37 = vld [vmem:[%s2101_s4] ss:$0 sm:$0xff]  ;;  %vm1746_vm8 = vmand %vm160_vm5, %vm161_vm6  ;;  %v34_v3 = vld [vmem:[%s2098_s0 + $0x18] sm:$0xff] }
   0x8   :  { %243 = vmatpush.bf16.msra.mxu2 %v1696_v14  ;;  %309 = vmatpush.bf16.msra.mxu3 %v1696_v14 }
   0x9   :  { %131 = vmatpush.msra.mxu0 %v90_v5  ;;  %202 = vmatpush.bf16.msra.mxu1 %v168_v28 }
   0xa   :  { %43 = vperm.xlu0 %1469, %v32_v6  }
   0xb   :  { %132 = vmatpush.msra.mxu0 %v89_v7 }
   0xc   :  { %244 = vmatpush.bf16.msra.mxu2 %v1702_v16  ;;  %310 = vmatpush.bf16.msra.mxu3 %v1702_v16 }
   0xd   :  { %133 = vmatpush.msra.mxu0 %v88_v8  ;;  %203 = vmatpush.bf16.msra.mxu1 %v167_v31 }
   0xf   :  { %134 = vmatpush.msra.mxu0 %v87_v10  ;;  %245 = vmatmul.bf16.vlgmr.msra.gmra.mxu2 %v1609_v0 }
  0x10   :  { %376 = vmatpush.bf16.msrb.mxu2 %v1696_v14  ;;  %443 = vmatpush.bf16.msrb.mxu3 %v1696_v14 }
  0x12   :  { %46 = vperm.xlu0 %1469, %v33_v9  }
  0x14   :  { %377 = vmatpush.bf16.msrb.mxu2 %v1702_v16  ;;  %444 = vmatpush.bf16.msrb.mxu3 %v1702_v16 }
  0x18   :  { %510 = vmatpush.bf16.msra.mxu2 %v1696_v14 }
  0x1c   :  { %511 = vmatpush.bf16.msra.mxu2 %v1702_v16 }
  0x74   :  { %v41_v19 = vpop.permute.xlu0 %40 }
  0x75   :  { %vm63_vm1 = vcmp.eq.s32.totalorder %v1709_v18, %v41_v19 }
  0x76   :  { %v1400_v21 = vsel %vm63_vm1, 1.0, %v1610_v20 }
  0x77   :  { %1408 = vmatmul.msk.f32.vlgmr.msra.gmra.mxu0 %vm94_vm0, %v1400_v21 }
  0x7c   :  { %v44_v22 = vpop.permute.xlu0 %43 }
  0x7d   :  { %vm64_vm2 = vcmp.eq.s32.totalorder %v1709_v18, %v44_v22 }
  0x7e   :  { %v1401_v23 = vsel %vm64_vm2, 1.0, %v1610_v20 }
  0x7f   :  { %1409 = vmatmul.msk.f32.gmra.mxu0 %vm94_vm0, %v1401_v23 }
  0x84   :  { %v47_v24 = vpop.permute.xlu0 %46 }
  0x85   :  { %vm65_vm3 = vcmp.eq.s32.totalorder %v1709_v18, %v47_v24 }
  0x86   :  { %v1402_v25 = vsel %vm65_vm3, 1.0, %v1610_v20 }
  0x87   :  { %1410 = vmatmul.msk.f32.gmra.mxu0 %vm94_vm0, %v1402_v25 }
  0x92   :  { %v246_v33 = vpop.f32.mrf.mxu2 }
  0x9a   :  { %v248_v35 = vpop.f32.mrf.mxu2 }
  0xf4   :  { %v136_v32 = vpop.f32.mrf.mxu0 }
  0xfc   :  { %v139_v34 = vpop.f32.mrf.mxu0 }
  0xfd   :  { %v175_v36 = vpack.c.bf16 %v139_v34, %v136_v32 }
  0xff   :  { %1416 = vmatmul.msk.bf16.vlgmr.msra.gmra.mxu1 %vm183_vm4, %v175_v36 }
 0x104   :  { %v142_v7 = vpop.f32.mrf.mxu0 }
 0x17c   :  { %v205_v38 = vpop.f32.mrf.mxu1 }
 0x17d   :  { %v206_v39 = vadd.f32 %v1741_v37, %v205_v38 }
 0x17f   :  { %v250_v40 = vadd.f32 %v246_v33, %v206_v39 }
 0x181   :  { %v1420_v41 = vmul.f32 -1.442695, %v250_v40 }
 0x183   :  { %1476 = vpow2.f32 %v1420_v41 }
 0x184   :  { %v207_v8 = vpop.f32.mrf.mxu1 }
 0x185   :  { %v208_v9 = vadd.f32 %v1741_v37, %v207_v8 }
 0x189   :  { %v1477_v42 = vpop.eup %1476 }
 0x18a   :  { %v255_v43 = vadd.f32 1.0, %v1477_v42 }
 0x18c   :  { %1478 = vrcp.f32 %v255_v43  ;;  %v267_v47 = vand.u32 2147483648, %v255_v43  ;;  %v265_v49 = vand.u32 2147483647, %v255_v43  ;;  %vm261_vm9 = vweird.f32 %v255_v43 }
 0x18d   :  { %1480 = vtanh.f32 %v250_v40 }
 0x18e   :  { %v268_v52 = vor.u32 1.1754944e-38, %v267_v47  ;;  %vm266_vm11 = vcmp.eq.f32.partialorder %v265_v49, 8.507059e+37 }
 0x192   :  { %v1479_v44 = vpop.eup %1478 }
 0x193   :  { %v257_v45 = vmul.f32 %v1479_v44, %v255_v43  ;;  %vm262_vm7 = vweird.f32 %v1479_v44  ;;  %v1481_v54 = vpop.eup %1480 }
 0x194   :  { %vm263_vm10 = vmor %vm261_vm9, %vm262_vm7 }
 0x195   :  { %v258_v46 = vsub.f32 1.0, %v257_v45 }
 0x197   :  { %v259_v48 = vmul.f32 %v1479_v44, %v258_v46 }
 0x199   :  { %v260_v51 = vadd.f32 %v1479_v44, %v259_v48 }
 0x19b   :  { %v264_v53 = vsel %vm263_vm10, %v1479_v44, %v260_v51 }
 0x19c   :  { %v269_v55 = vsel %vm266_vm11, %v268_v52, %v264_v53 }
 0x19d   :  { %v271_v56 = vsel %vm1746_vm8, %v1481_v54, %v269_v55 }
 0x19e   :  { %274 = vrot.lane.b32.xlu1 %v271_v56, %s1611_s15  ;;  %v272_v59 = vmul.f32 0.0, %v271_v56 }
 0x210   :  { %v275_v57 = vpop.permute.xlu1 %274 }
 0x211   :  { %v277_v58 = vmul.f32 %v275_v57, %v271_v56 }
 0x213   :  { %279 = vrot.lane.b32.xlu1 %v277_v58, %s1612_s16 }
 0x285   :  { %v280_v60 = vpop.permute.xlu1 %279 }
 0x286   :  { %v282_v61 = vadd.f32 %v280_v60, %v272_v59 }
 0x288   :  { %1482 = vtanh.f32 %v282_v61 }
 0x28e   :  { %v1483_v62 = vpop.eup %1482 }
 0x28f   :  { %285 = vrot.lane.b32.xlu2 %v1483_v62, %s1611_s15 }
 0x2e9   :  { %v286_v63 = vpop.permute.xlu2 %285 }
 0x2ea   :  { %v1755_v1 = vmul.f32 %v286_v63, %v271_v56 }
 0x2ec   :  { %v296_v2 = vpack.c.bf16 %v1755_v1, %v1755_v1 }
 0x2ee   :  { %298 = vrot.lane.b32.xlu2 %v296_v2, %s1612_s16 }
 0x2f6   :  { %49 = vperm.xlu2 %1470, %v34_v3  }
 0x348   :  { %v299_v4 = vpop.permute.xlu2 %298 }
 0x349   :  { %1421 = vmatmul.msk.bf16.vlgmr.msra.gmra.mxu3 %vm183_vm4, %v299_v4 }
 0x34a   :  { %577 = vmatpush.bf16.msra.mxu3 %v1696_v14 }
 0x34e   :  { %578 = vmatpush.bf16.msra.mxu3 %v1702_v16 }
 0x350   :  { %v50_v5 = vpop.permute.xlu2 %49 }
 0x351   :  { %vm66_vm12 = vcmp.eq.s32.totalorder %v1709_v18, %v50_v5 }
 0x352   :  { %v1403_v6 = vsel %vm66_vm12, 1.0, %v1610_v20 }
 0x353   :  { %1411 = vmatmul.msk.f32.gmra.mxu0 %vm94_vm0, %v1403_v6 }
 0x3cc   :  { %v312_v10 = vpop.f32.mrf.mxu3 }
 0x3cd   :  { %v316_v11 = vadd.f32 %v312_v10, %v208_v9  ;;  %v35_v10 = vld [vmem:[%s2098_s0 + $0x20] sm:$0xff] }
 0x3cf   :  { %v1422_v12 = vmul.f32 -1.442695, %v316_v11 }
 0x3d0   :  { %v145_v13 = vpop.f32.mrf.mxu0 }
 0x3d1   :  { %1484 = vpow2.f32 %v1422_v12  ;;  %v176_v15 = vpack.c.bf16 %v145_v13, %v142_v7 }
 0x3d3   :  { %1417 = vmatmul.msk.bf16.gmra.mxu1 %vm183_vm4, %v176_v15  ;;  %v36_v15 = vld [vmem:[%s2098_s0 + $0x28] sm:$0xff] }
 0x3d4   :  { %v314_v17 = vpop.f32.mrf.mxu3 }
 0x3d7   :  { %v1485_v19 = vpop.eup %1484 }
 0x3d8   :  { %v321_v21 = vadd.f32 1.0, %v1485_v19 }
 0x3da   :  { %1486 = vrcp.f32 %v321_v21  ;;  %v333_v25 = vand.u32 2147483648, %v321_v21  ;;  %v331_v27 = vand.u32 2147483647, %v321_v21  ;;  %vm327_vm14 = vweird.f32 %v321_v21 }
 0x3db   :  { %1488 = vtanh.f32 %v316_v11 }
 0x3dc   :  { %v334_v29 = vor.u32 1.1754944e-38, %v333_v25  ;;  %vm332_vm1 = vcmp.eq.f32.partialorder %v331_v27, 8.507059e+37 }
 0x3e0   :  { %v1487_v22 = vpop.eup %1486 }
 0x3e1   :  { %v323_v23 = vmul.f32 %v1487_v22, %v321_v21  ;;  %vm328_vm13 = vweird.f32 %v1487_v22  ;;  %v1489_v31 = vpop.eup %1488 }
 0x3e2   :  { %vm329_vm15 = vmor %vm327_vm14, %vm328_vm13 }
 0x3e3   :  { %v324_v24 = vsub.f32 1.0, %v323_v23 }
 0x3e5   :  { %v325_v26 = vmul.f32 %v1487_v22, %v324_v24 }
 0x3e7   :  { %v326_v28 = vadd.f32 %v1487_v22, %v325_v26 }
 0x3e9   :  { %v330_v30 = vsel %vm329_vm15, %v1487_v22, %v326_v28 }
 0x3ea   :  { %v335_v32 = vsel %vm332_vm1, %v334_v29, %v330_v30 }
 0x3eb   :  { %v337_v33 = vsel %vm1746_vm8, %v1489_v31, %v335_v32 }
 0x3ec   :  { %340 = vrot.lane.b32.xlu1 %v337_v33, %s1611_s15  ;;  %v338_v36 = vmul.f32 %v337_v33, %v282_v61 }
 0x450   :  { %v210_v45 = vpop.f32.mrf.mxu1 }
 0x451   :  { %v211_v46 = vadd.f32 %v1741_v37, %v210_v45 }
 0x458   :  { %v212_v25 = vpop.f32.mrf.mxu1 }
 0x459   :  { %v213_v26 = vadd.f32 %v1741_v37, %v212_v25 }
 0x45e   :  { %v341_v34 = vpop.permute.xlu1 %340 }
 0x45f   :  { %v343_v35 = vmul.f32 %v341_v34, %v337_v33 }
 0x461   :  { %345 = vrot.lane.b32.xlu0 %v343_v35, %s1612_s16 }
 0x4d3   :  { %v346_v38 = vpop.permute.xlu0 %345 }
 0x4d4   :  { %v348_v39 = vadd.f32 %v346_v38, %v338_v36 }
 0x4d6   :  { %1490 = vtanh.f32 %v348_v39 }
 0x4dc   :  { %v1491_v40 = vpop.eup %1490 }
 0x4dd   :  { %351 = vrot.lane.b32.xlu1 %v1491_v40, %s1611_s15 }
 0x54f   :  { %v352_v41 = vpop.permute.xlu1 %351 }
 0x550   :  { %v1776_v42 = vmul.f32 %v352_v41, %v337_v33 }
 0x552   :  { %v363_v43 = vpack.c.bf16 %v1776_v42, %v1776_v42 }
 0x554   :  { %365 = vrot.lane.b32.xlu2 %v363_v43, %s1612_s16 }
 0x5ae   :  { %v366_v44 = vpop.permute.xlu2 %365 }
 0x5af   :  { %1423 = vmatmul.msk.bf16.vlgmr.msrb.gmra.mxu2 %vm183_vm4, %v366_v44 }
 0x5b0   :  { %644 = vmatpush.bf16.msrb.mxu2 %v1696_v14 }
 0x5b4   :  { %645 = vmatpush.bf16.msrb.mxu2 %v1702_v16 }
 0x632   :  { %v379_v47 = vpop.f32.mrf.mxu2 }
 0x633   :  { %v383_v48 = vadd.f32 %v379_v47, %v211_v46 }
 0x635   :  { %v1424_v49 = vmul.f32 -1.442695, %v383_v48 }
 0x637   :  { %1492 = vpow2.f32 %v1424_v49 }
 0x63a   :  { %v381_v51 = vpop.f32.mrf.mxu2 }
 0x63d   :  { %v1493_v52 = vpop.eup %1492 }
 0x63e   :  { %v388_v53 = vadd.f32 1.0, %v1493_v52 }
 0x640   :  { %1494 = vrcp.f32 %v388_v53  ;;  %v400_v57 = vand.u32 2147483648, %v388_v53  ;;  %v398_v59 = vand.u32 2147483647, %v388_v53  ;;  %vm394_vm3 = vweird.f32 %v388_v53 }
 0x641   :  { %1496 = vtanh.f32 %v383_v48 }
 0x642   :  { %v401_v61 = vor.u32 1.1754944e-38, %v400_v57  ;;  %vm399_vm6 = vcmp.eq.f32.partialorder %v398_v59, 8.507059e+37 }
 0x646   :  { %v1495_v54 = vpop.eup %1494 }
 0x647   :  { %v390_v55 = vmul.f32 %v1495_v54, %v388_v53  ;;  %vm395_vm2 = vweird.f32 %v1495_v54  ;;  %v1497_v63 = vpop.eup %1496 }
 0x648   :  { %vm396_vm5 = vmor %vm394_vm3, %vm395_vm2 }
 0x649   :  { %v391_v56 = vsub.f32 1.0, %v390_v55 }
 0x64b   :  { %v392_v58 = vmul.f32 %v1495_v54, %v391_v56 }
 0x64d   :  { %v393_v60 = vadd.f32 %v1495_v54, %v392_v58 }
 0x64f   :  { %v397_v62 = vsel %vm396_vm5, %v1495_v54, %v393_v60 }
 0x650   :  { %v402_v2 = vsel %vm399_vm6, %v401_v61, %v397_v62 }
 0x651   :  { %v404_v3 = vsel %vm1746_vm8, %v1497_v63, %v402_v2 }
 0x652   :  { %407 = vrot.lane.b32.xlu0 %v404_v3, %s1611_s15  ;;  %v405_v6 = vmul.f32 %v404_v3, %v348_v39 }
 0x6c4   :  { %v408_v4 = vpop.permute.xlu0 %407 }
 0x6c5   :  { %v410_v5 = vmul.f32 %v408_v4, %v404_v3 }
 0x6c7   :  { %412 = vrot.lane.b32.xlu1 %v410_v5, %s1612_s16 }
 0x6cf   :  { %52 = vperm.xlu1 %1471, %v35_v10  }
 0x739   :  { %v413_v7 = vpop.permute.xlu1 %412 }
 0x73a   :  { %v415_v8 = vadd.f32 %v413_v7, %v405_v6 }
 0x73c   :  { %1498 = vtanh.f32 %v415_v8 }
 0x741   :  { %v53_v17 = vpop.permute.xlu1 %52 }
 0x742   :  { %v1499_v9 = vpop.eup %1498  ;;  %vm67_vm7 = vcmp.eq.s32.totalorder %v1709_v18, %v53_v17 }
 0x743   :  { %418 = vrot.lane.b32.xlu2 %v1499_v9, %s1611_s15  ;;  %v1404_v19 = vsel %vm67_vm7, 1.0, %v1610_v20 }
 0x744   :  { %1412 = vmatmul.msk.f32.gmra.mxu0 %vm94_vm0, %v1404_v19 }
 0x79d   :  { %v419_v11 = vpop.permute.xlu2 %418 }
 0x79e   :  { %v1793_v12 = vmul.f32 %v419_v11, %v404_v3 }
 0x7a0   :  { %v430_v13 = vpack.c.bf16 %v1793_v12, %v1793_v12 }
 0x7a2   :  { %432 = vrot.lane.b32.xlu0 %v430_v13, %s1612_s16 }
 0x7aa   :  { %55 = vperm.xlu0 %1469, %v36_v15  }
 0x7c1   :  { %v148_v24 = vpop.f32.mrf.mxu0 }
 0x814   :  { %v433_v21 = vpop.permute.xlu0 %432 }
 0x815   :  { %1425 = vmatmul.msk.bf16.vlgmr.msrb.gmra.mxu3 %vm183_vm4, %v433_v21 }
 0x816   :  { %711 = vmatpush.bf16.msrb.mxu3 %v1696_v14 }
 0x81a   :  { %712 = vmatpush.bf16.msrb.mxu3 %v1702_v16 }
 0x81c   :  { %v56_v22 = vpop.permute.xlu0 %55 }
 0x81d   :  { %vm68_vm9 = vcmp.eq.s32.totalorder %v1709_v18, %v56_v22 }
 0x81e   :  { %v1405_v23 = vsel %vm68_vm9, 1.0, %v1610_v20 }
 0x81f   :  { %1413 = vmatmul.msk.f32.gmra.mxu0 %vm94_vm0, %v1405_v23  ;;  %v37_v23 = vld [vmem:[%s2098_s0 + $0x30] sm:$0xff] }
 0x898   :  { %v446_v27 = vpop.f32.mrf.mxu3 }
 0x899   :  { %v450_v28 = vadd.f32 %v446_v27, %v213_v26 }
 0x89b   :  { %v1426_v29 = vmul.f32 -1.442695, %v450_v28 }
 0x89c   :  { %v151_v30 = vpop.f32.mrf.mxu0 }
 0x89d   :  { %1500 = vpow2.f32 %v1426_v29  ;;  %v177_v31 = vpack.c.bf16 %v151_v30, %v148_v24 }
 0x89f   :  { %1418 = vmatmul.msk.bf16.gmra.mxu1 %vm183_vm4, %v177_v31 }
 0x8a0   :  { %v448_v14 = vpop.f32.mrf.mxu3 }
 0x8a3   :  { %v1501_v16 = vpop.eup %1500 }
 0x8a4   :  { %v455_v32 = vadd.f32 1.0, %v1501_v16  ;;  %v38_v16 = vld [vmem:[%s2098_s0 + $0x38] sm:$0xff] }
 0x8a6   :  { %1502 = vrcp.f32 %v455_v32  ;;  %v467_v36 = vand.u32 2147483648, %v455_v32  ;;  %v465_v39 = vand.u32 2147483647, %v455_v32  ;;  %vm461_vm11 = vweird.f32 %v455_v32 }
 0x8a7   :  { %1504 = vtanh.f32 %v450_v28 }
 0x8a8   :  { %v468_v41 = vor.u32 1.1754944e-38, %v467_v36  ;;  %vm466_vm13 = vcmp.eq.f32.partialorder %v465_v39, 8.507059e+37 }
 0x8ac   :  { %v1503_v33 = vpop.eup %1502 }
 0x8ad   :  { %v457_v34 = vmul.f32 %v1503_v33, %v455_v32  ;;  %vm462_vm10 = vweird.f32 %v1503_v33  ;;  %v1505_v44 = vpop.eup %1504 }
 0x8ae   :  { %vm463_vm12 = vmor %vm461_vm11, %vm462_vm10 }
 0x8af   :  { %v458_v35 = vsub.f32 1.0, %v457_v34 }
 0x8b1   :  { %v459_v38 = vmul.f32 %v1503_v33, %v458_v35 }
 0x8b3   :  { %v460_v40 = vadd.f32 %v1503_v33, %v459_v38 }
 0x8b5   :  { %v464_v43 = vsel %vm463_vm12, %v1503_v33, %v460_v40 }
 0x8b6   :  { %v469_v45 = vsel %vm466_vm13, %v468_v41, %v464_v43 }
 0x8b7   :  { %v471_v46 = vsel %vm1746_vm8, %v1505_v44, %v469_v45 }
 0x8b8   :  { %474 = vrot.lane.b32.xlu2 %v471_v46, %s1611_s15  ;;  %v472_v49 = vmul.f32 %v471_v46, %v415_v8 }
 0x912   :  { %v475_v47 = vpop.permute.xlu2 %474 }
 0x913   :  { %v477_v48 = vmul.f32 %v475_v47, %v471_v46 }
 0x915   :  { %479 = vrot.lane.b32.xlu1 %v477_v48, %s1612_s16 }
 0x91c   :  { %v215_v58 = vpop.f32.mrf.mxu1 }
 0x91d   :  { %v216_v59 = vadd.f32 %v1741_v37, %v215_v58 }
 0x924   :  { %v217_v35 = vpop.f32.mrf.mxu1 }
 0x925   :  { %v218_v38 = vadd.f32 %v1741_v37, %v217_v35  ;;  %v1917_v35 = vld [vmem:[%s2101_s4 + $0x1] ss:$0 sm:$0xff] }
 0x987   :  { %v480_v51 = vpop.permute.xlu1 %479 }
 0x988   :  { %v482_v52 = vadd.f32 %v480_v51, %v472_v49 }
 0x98a   :  { %1506 = vtanh.f32 %v482_v52 }
 0x990   :  { %v1507_v53 = vpop.eup %1506 }
 0x991   :  { %485 = vrot.lane.b32.xlu2 %v1507_v53, %s1611_s15 }
 0x9eb   :  { %v486_v54 = vpop.permute.xlu2 %485 }
 0x9ec   :  { %v1817_v55 = vmul.f32 %v486_v54, %v471_v46 }
 0x9ee   :  { %v497_v56 = vpack.c.bf16 %v1817_v55, %v1817_v55 }
 0x9f0   :  { %499 = vrot.lane.b32.xlu0 %v497_v56, %s1612_s16 }
 0xa62   :  { %v500_v57 = vpop.permute.xlu0 %499 }
 0xa63   :  { %1427 = vmatmul.msk.bf16.vlgmr.msra.gmra.mxu2 %vm183_vm4, %v500_v57 }
 0xae6   :  { %v513_v60 = vpop.f32.mrf.mxu2 }
 0xae7   :  { %v517_v61 = vadd.f32 %v513_v60, %v216_v59 }
 0xae9   :  { %v1428_v62 = vmul.f32 -1.442695, %v517_v61 }
 0xaeb   :  { %1508 = vpow2.f32 %v1428_v62 }
 0xaee   :  { %v515_v63 = vpop.f32.mrf.mxu2 }
 0xaf1   :  { %v1509_v2 = vpop.eup %1508 }
 0xaf2   :  { %v522_v3 = vadd.f32 1.0, %v1509_v2 }
 0xaf4   :  { %1510 = vrcp.f32 %v522_v3  ;;  %v534_v7 = vand.u32 2147483648, %v522_v3  ;;  %v532_v9 = vand.u32 2147483647, %v522_v3  ;;  %vm528_vm15 = vweird.f32 %v522_v3 }
 0xaf5   :  { %1512 = vtanh.f32 %v517_v61 }
 0xaf6   :  { %v535_v11 = vor.u32 1.1754944e-38, %v534_v7  ;;  %vm533_vm2 = vcmp.eq.f32.partialorder %v532_v9, 8.507059e+37 }
 0xafa   :  { %v1511_v4 = vpop.eup %1510 }
 0xafb   :  { %v524_v5 = vmul.f32 %v1511_v4, %v522_v3  ;;  %vm529_vm14 = vweird.f32 %v1511_v4  ;;  %v1513_v15 = vpop.eup %1512 }
 0xafc   :  { %vm530_vm1 = vmor %vm528_vm15, %vm529_vm14 }
 0xafd   :  { %v525_v6 = vsub.f32 1.0, %v524_v5  ;;  %v1437_v5 = vld [vmem:[%s2102_s2 + $0x30] sm:$0xff] }
 0xaff   :  { %v526_v8 = vmul.f32 %v1511_v4, %v525_v6  ;;  %v1435_v6 = vld [vmem:[%s2102_s2 + $0x20] sm:$0xff] }
 0xb01   :  { %v527_v10 = vadd.f32 %v1511_v4, %v526_v8  ;;  %v1436_v8 = vld [vmem:[%s2102_s2 + $0x28] sm:$0xff] }
 0xb02   :  { %v776_v9 = vpack.c.bf16 %v1436_v8, %v1435_v6 }
 0xb03   :  { %v531_v13 = vsel %vm530_vm1, %v1511_v4, %v527_v10 }
 0xb04   :  { %v536_v17 = vsel %vm533_vm2, %v535_v11, %v531_v13 }
 0xb05   :  { %v538_v19 = vsel %vm1746_vm8, %v1513_v15, %v536_v17 }
 0xb06   :  { %541 = vrot.lane.b32.xlu1 %v538_v19, %s1611_s15  ;;  %v539_v24 = vmul.f32 %v538_v19, %v482_v52 }
 0xb78   :  { %v542_v21 = vpop.permute.xlu1 %541 }
 0xb79   :  { %v544_v22 = vmul.f32 %v542_v21, %v538_v19  ;;  %v1441_v21 = vld [vmem:[%s2100_s3 + $0x30] sm:$0xff] }
 0xb7b   :  { %546 = vrot.lane.b32.xlu2 %v544_v22, %s1612_s16  ;;  %v1442_v22 = vld [vmem:[%s2100_s3 + $0x38] sm:$0xff] }
 0xb83   :  { %58 = vperm.xlu2 %1470, %v37_v23   ;;  %v1439_v23 = vld [vmem:[%s2100_s3 + $0x20] sm:$0xff] }
 0xbd5   :  { %v547_v25 = vpop.permute.xlu2 %546 }
 0xbd6   :  { %v549_v26 = vadd.f32 %v547_v25, %v539_v24  ;;  %v1890_v24 = vpack.c.bf16 %v1442_v22, %v1441_v21  ;;  %v1440_v25 = vld [vmem:[%s2100_s3 + $0x28] sm:$0xff] }
 0xbd8   :  { %1514 = vtanh.f32 %v549_v26  ;;  %850 = vmatpush.bf16.msra.mxu2 %v1890_v24  ;;  %980 = vmatpush.bf16.msrb.mxu0 %v1890_v24 }
 0xbdd   :  { %v59_v27 = vpop.permute.xlu2 %58 }
 0xbde   :  { %v1515_v28 = vpop.eup %1514  ;;  %vm69_vm3 = vcmp.eq.s32.totalorder %v1709_v18, %v59_v27 }
 0xbdf   :  { %v1406_v29 = vsel %vm69_vm3, 1.0, %v1610_v20  ;;  %552 = vrot.lane.b32.xlu0 %v1515_v28, %s1611_s15 }
 0xbe0   :  { %1414 = vmatmul.msk.f32.gmra.mxu0 %vm94_vm0, %v1406_v29 }
 0xc51   :  { %v553_v30 = vpop.permute.xlu0 %552 }
 0xc52   :  { %v1835_v31 = vmul.f32 %v553_v30, %v538_v19 }
 0xc54   :  { %v564_v14 = vpack.c.bf16 %v1835_v31, %v1835_v31 }
 0xc56   :  { %566 = vrot.lane.b32.xlu1 %v564_v14, %s1612_s16 }
 0xc5d   :  { %v154_v36 = vpop.f32.mrf.mxu0 }
 0xc5e   :  { %61 = vperm.xlu1 %1471, %v38_v16  }
 0xcc8   :  { %v567_v32 = vpop.permute.xlu1 %566 }
 0xcc9   :  { %1429 = vmatmul.msk.bf16.vlgmr.msra.gmra.mxu3 %vm183_vm4, %v567_v32 }
 0xcca   :  { %915 = vmatpush.bf16.msra.mxu3 %v1890_v24 }
 0xcd0   :  { %v62_v33 = vpop.permute.xlu1 %61 }
 0xcd1   :  { %vm70_vm5 = vcmp.eq.s32.totalorder %v1709_v18, %v62_v33 }
 0xcd2   :  { %v1407_v34 = vsel %vm70_vm5, 1.0, %v1610_v20 }
 0xcd3   :  { %1415 = vmatmul.msk.f32.gmra.mxu0 %vm94_vm0, %v1407_v34 }
 0xd4c   :  { %v580_v39 = vpop.f32.mrf.mxu3 }
 0xd4d   :  { %v584_v40 = vadd.f32 %v580_v39, %v218_v38 }
 0xd4f   :  { %v1430_v41 = vmul.f32 -1.442695, %v584_v40 }
 0xd50   :  { %v157_v43 = vpop.f32.mrf.mxu0 }
 0xd51   :  { %1516 = vpow2.f32 %v1430_v41  ;;  %v178_v44 = vpack.c.bf16 %v157_v43, %v154_v36 }
 0xd53   :  { %1419 = vmatmul.msk.bf16.gmra.mxu1 %vm183_vm4, %v178_v44 }
 0xd54   :  { %v582_v45 = vpop.f32.mrf.mxu3 }
 0xd57   :  { %v1517_v46 = vpop.eup %1516 }
 0xd58   :  { %v589_v47 = vadd.f32 1.0, %v1517_v46 }
 0xd5a   :  { %1518 = vrcp.f32 %v589_v47  ;;  %v601_v49 = vand.u32 2147483648, %v589_v47  ;;  %v599_v52 = vand.u32 2147483647, %v589_v47  ;;  %vm595_vm6 = vweird.f32 %v589_v47 }
 0xd5b   :  { %1520 = vtanh.f32 %v584_v40 }
 0xd5c   :  { %v602_v54 = vor.u32 1.1754944e-38, %v601_v49  ;;  %vm600_vm9 = vcmp.eq.f32.partialorder %v599_v52, 8.507059e+37 }
 0xd60   :  { %v1519_v18 = vpop.eup %1518 }
 0xd61   :  { %v591_v20 = vmul.f32 %v1519_v18, %v589_v47  ;;  %vm596_vm0 = vweird.f32 %v1519_v18  ;;  %v1521_v57 = vpop.eup %1520 }
 0xd62   :  { %vm597_vm7 = vmor %vm595_vm6, %vm596_vm0 }
 0xd63   :  { %v592_v48 = vsub.f32 1.0, %v591_v20 }
 0xd65   :  { %v593_v51 = vmul.f32 %v1519_v18, %v592_v48 }
 0xd67   :  { %v594_v53 = vadd.f32 %v1519_v18, %v593_v51 }
 0xd69   :  { %v598_v56 = vsel %vm597_vm7, %v1519_v18, %v594_v53 }
 0xd6a   :  { %v603_v58 = vsel %vm600_vm9, %v602_v54, %v598_v56 }
 0xd6b   :  { %v605_v59 = vsel %vm1746_vm8, %v1521_v57, %v603_v58 }
 0xd6c   :  { %608 = vrot.lane.b32.xlu0 %v605_v59, %s1611_s15  ;;  %v606_v62 = vmul.f32 %v605_v59, %v549_v26  ;;  %v1896_v26 = vpack.c.bf16 %v1440_v25, %v1439_v23 }
 0xd6e   :  { %851 = vmatpush.bf16.msra.mxu2 %v1896_v26  ;;  %916 = vmatpush.bf16.msra.mxu3 %v1896_v26 }
 0xd6f   :  { %981 = vmatpush.bf16.msrb.mxu0 %v1896_v26 }
 0xd73   :  { %1175 = vmatpush.bf16.msra.mxu0 %v1890_v24 }
 0xd77   :  { %1176 = vmatpush.bf16.msra.mxu0 %v1896_v26 }
 0xdd0   :  { %v220_v28 = vpop.f32.mrf.mxu1 }
 0xdd1   :  { %v221_v29 = vadd.f32 %v1741_v37, %v220_v28 }
 0xdd8   :  { %v1912_v32 = vpop.f32.mrf.mxu1 }
 0xdde   :  { %v609_v60 = vpop.permute.xlu0 %608 }
 0xddf   :  { %v611_v61 = vmul.f32 %v609_v60, %v605_v59 }
 0xde1   :  { %613 = vrot.lane.b32.xlu2 %v611_v61, %s1612_s16 }
 0xde9   :  { %290 = vrot.lane.b32.xlu2 %v1755_v1, %s1612_s16  ;;  %v1438_v1 = vld [vmem:[%s2102_s2 + $0x38] sm:$0xff] }
 0xdea   :  { %v777_v7 = vpack.c.bf16 %v1438_v1, %v1437_v5 }
 0xdec   :  { %812 = vmatpush.bf16.msrb.mxu1 %v777_v7 }
 0xdf0   :  { %813 = vmatpush.bf16.msrb.mxu1 %v776_v9 }
 0xe3b   :  { %v614_v63 = vpop.permute.xlu2 %613 }
 0xe3c   :  { %v1855_v2 = vadd.f32 %v614_v63, %v606_v62 }
 0xe3e   :  { %1522 = vtanh.f32 %v1855_v2 }
 0xe43   :  { %v291_v3 = vpop.permute.xlu2 %290 }
 0xe44   :  { %v1523_v4 = vpop.eup %1522  ;;  %293 = vst.msk [vmem:[#allocation3] sm:$0xff] %vm183_vm4, %v291_v3 }
 0xe45   :  { %619 = vrot.lane.b32.xlu0 %v1523_v4, %s1611_s15 }
 0xe4b   :  { %v763_v15 = vld [vmem:[#allocation3] sm:$0xff] }
 0xe4d   :  { %356 = vrot.lane.b32.xlu0 %v1776_v42, %s1612_s16 }
 0xeb7   :  { %v620_v42 = vpop.permute.xlu0 %619 }
 0xeb8   :  { %v1874_v10 = vmul.f32 %v620_v42, %v605_v59 }
 0xeba   :  { %v631_v11 = vpack.c.bf16 %v1874_v10, %v1874_v10 }
 0xebc   :  { %633 = vrot.lane.b32.xlu1 %v631_v11, %s1612_s16 }
 0xebf   :  { %v357_v13 = vpop.permute.xlu0 %356 }
 0xec0   :  { %360 = vst.msk [vmem:[#allocation3 + $0x8] sm:$0xff] %vm183_vm4, %v357_v13 }
 0xec7   :  { %v764_v17 = vld [vmem:[#allocation3 + $0x8] sm:$0xff] }
 0xec8   :  { %v785_v19 = vpack.c.bf16 %v764_v17, %v763_v15 }
 0xeca   :  { %1444 = vmatmul.msk.bf16.vlgmr.msrb.gmra.mxu1 %vm183_vm4, %v785_v19 }
 0xf2e   :  { %v634_v27 = vpop.permute.xlu1 %633 }
 0xf2f   :  { %1431 = vmatmul.msk.bf16.vlgmr.msrb.gmra.mxu2 %vm183_vm4, %v634_v27 }
 0xf30   :  { %1045 = vmatpush.bf16.msrb.mxu2 %v1890_v24 }
 0xf34   :  { %1046 = vmatpush.bf16.msrb.mxu2 %v1896_v26 }
 0xf3f   :  { %852 = vmatmul.bf16.vlgmr.msra.gmra.mxu2 %v1609_v0 }
 0xf40   :  { %1240 = vmatpush.bf16.msra.mxu2 %v1890_v24 }
 0xf44   :  { %1241 = vmatpush.bf16.msra.mxu2 %v1896_v26 }
 0xf47   :  { %v815_v0 = vpop.f32.mrf.mxu1 }
 0xf48   :  { %v816_v38 = vadd.f32 %v1917_v35, %v815_v0 }
 0xf4f   :  { %v817_v0 = vpop.f32.mrf.mxu1 }
 0xfb2   :  { %v647_v30 = vpop.f32.mrf.mxu2 }
 0xfb3   :  { %v651_v14 = vadd.f32 %v647_v30, %v221_v29 }
 0xfb5   :  { %v1432_v16 = vmul.f32 -1.442695, %v651_v14 }
 0xfb7   :  { %1524 = vpow2.f32 %v1432_v16 }
 0xfba   :  { %v649_v33 = vpop.f32.mrf.mxu2 }
 0xfbd   :  { %v1525_v34 = vpop.eup %1524 }
 0xfbe   :  { %v656_v36 = vadd.f32 1.0, %v1525_v34 }
 0xfc0   :  { %1526 = vrcp.f32 %v656_v36  ;;  %v668_v45 = vand.u32 2147483648, %v656_v36  ;;  %v666_v18 = vand.u32 2147483647, %v656_v36  ;;  %vm662_vm11 = vweird.f32 %v656_v36 }
 0xfc2   :  { %v853_v39 = vpop.f32.mrf.mxu2  ;;  %v669_v51 = vor.u32 1.1754944e-38, %v668_v45  ;;  %vm667_vm13 = vcmp.eq.f32.partialorder %v666_v18, 8.507059e+37 }
 0xfc3   :  { %v857_v37 = vadd.f32 %v853_v39, %v816_v38 }
 0xfc5   :  { %v1448_v40 = vmul.f32 -1.442695, %v857_v37 }
 0xfc6   :  { %v1527_v41 = vpop.eup %1526 }
 0xfc7   :  { %1528 = vpow2.f32 %v1448_v40  ;;  %v658_v43 = vmul.f32 %v1527_v41, %v656_v36  ;;  %vm663_vm10 = vweird.f32 %v1527_v41  ;;  %v818_v36 = vadd.f32 %v1917_v35, %v817_v0 }
 0xfc8   :  { %1530 = vtanh.f32 %v651_v14  ;;  %vm664_vm12 = vmor %vm662_vm11, %vm663_vm10 }
 0xfc9   :  { %v659_v44 = vsub.f32 1.0, %v658_v43 }
 0xfca   :  { %v855_v46 = vpop.f32.mrf.mxu2 }
 0xfcb   :  { %v660_v47 = vmul.f32 %v1527_v41, %v659_v44 }
 0xfcd   :  { %v1529_v20 = vpop.eup %1528  ;;  %v661_v48 = vadd.f32 %v1527_v41, %v660_v47 }
 0xfce   :  { %v862_v49 = vadd.f32 1.0, %v1529_v20  ;;  %v1531_v53 = vpop.eup %1530 }
 0xfcf   :  { %v665_v52 = vsel %vm664_vm12, %v1527_v41, %v661_v48 }
 0xfd0   :  { %1532 = vrcp.f32 %v862_v49  ;;  %v670_v54 = vsel %vm667_vm13, %v669_v51, %v665_v52  ;;  %v874_v60 = vand.u32 2147483648, %v862_v49  ;;  %v872_v62 = vand.u32 2147483647, %v862_v49 }
 0xfd1   :  { %v672_v56 = vsel %vm1746_vm8, %v1531_v53, %v670_v54  ;;  %1534 = vtanh.f32 %v857_v37  ;;  %vm868_vm15 = vweird.f32 %v862_v49 }
 0xfd2   :  { %675 = vrot.lane.b32.xlu1 %v672_v56, %s1611_s15  ;;  %v875_v3 = vor.u32 1.1754944e-38, %v874_v60  ;;  %vm873_vm2 = vcmp.eq.f32.partialorder %v872_v62, 8.507059e+37  ;;  %v673_v17 = vmul.f32 %v672_v56, %v1855_v2 }
 0xfd6   :  { %v1533_v57 = vpop.eup %1532 }
 0xfd7   :  { %v864_v58 = vmul.f32 %v1533_v57, %v862_v49  ;;  %vm869_vm14 = vweird.f32 %v1533_v57  ;;  %v1535_v5 = vpop.eup %1534 }
 0xfd8   :  { %vm870_vm1 = vmor %vm868_vm15, %vm869_vm14 }
 0xfd9   :  { %v865_v59 = vsub.f32 1.0, %v864_v58 }
 0xfdb   :  { %v866_v61 = vmul.f32 %v1533_v57, %v865_v59 }
 0xfdd   :  { %v867_v63 = vadd.f32 %v1533_v57, %v866_v61 }
 0xfdf   :  { %v871_v4 = vsel %vm870_vm1, %v1533_v57, %v867_v63 }
 0xfe0   :  { %v876_v1 = vsel %vm873_vm2, %v875_v3, %v871_v4 }
 0xfe1   :  { %v878_v6 = vsel %vm1746_vm8, %v1535_v5, %v876_v1 }
 0xfe2   :  { %881 = vrot.lane.b32.xlu2 %v878_v6, %s1611_s15  ;;  %v879_v11 = vmul.f32 0.0, %v878_v6 }
0x103c   :  { %v882_v7 = vpop.permute.xlu2 %881 }
0x103d   :  { %v884_v8 = vmul.f32 %v882_v7, %v878_v6 }
0x103f   :  { %886 = vrot.lane.b32.xlu1 %v884_v8, %s1612_s16 }
0x1044   :  { %v676_v9 = vpop.permute.xlu1 %675 }
0x1045   :  { %v678_v42 = vmul.f32 %v676_v9, %v672_v56 }
0x1047   :  { %680 = vrot.lane.b32.xlu0 %v678_v42, %s1612_s16 }
0x10b1   :  { %v887_v13 = vpop.permute.xlu1 %886 }
0x10b2   :  { %v1928_v15 = vadd.f32 %v887_v13, %v879_v11 }
0x10b4   :  { %1536 = vtanh.f32 %v1928_v15 }
0x10b9   :  { %v681_v19 = vpop.permute.xlu0 %680 }
0x10ba   :  { %v1537_v21 = vpop.eup %1536  ;;  %v1932_v22 = vadd.f32 %v681_v19, %v673_v17 }
0x10bb   :  { %892 = vrot.lane.b32.xlu0 %v1537_v21, %s1611_s15 }
0x10bc   :  { %1538 = vtanh.f32 %v1932_v22 }
0x10c2   :  { %v1539_v23 = vpop.eup %1538 }
0x10c3   :  { %686 = vrot.lane.b32.xlu2 %v1539_v23, %s1611_s15 }
0x111d   :  { %v687_v25 = vpop.permute.xlu2 %686 }
0x111e   :  { %v1937_v27 = vmul.f32 %v687_v25, %v672_v56 }
0x1120   :  { %v698_v28 = vpack.c.bf16 %v1937_v27, %v1937_v27 }
0x1122   :  { %700 = vrot.lane.b32.xlu1 %v698_v28, %s1612_s16 }
0x112d   :  { %v893_v2 = vpop.permute.xlu0 %892 }
0x112e   :  { %v1942_v29 = vmul.f32 %v893_v2, %v878_v6 }
0x1130   :  { %v902_v30 = vpack.c.bf16 %v1942_v29, %v1942_v29 }
0x1132   :  { %904 = vrot.lane.b32.xlu2 %v902_v30, %s1612_s16 }
0x118c   :  { %v905_v16 = vpop.permute.xlu2 %904 }
0x1194   :  { %v701_v14 = vpop.permute.xlu1 %700 }
0x1195   :  { %1433 = vmatmul.msk.bf16.vlgmr.msrb.gmra.mxu3 %vm183_vm4, %v701_v14 }
0x1196   :  { %1110 = vmatpush.bf16.msrb.mxu3 %v1890_v24 }
0x119a   :  { %1111 = vmatpush.bf16.msrb.mxu3 %v1896_v26 }
0x11a5   :  { %1449 = vmatmul.msk.bf16.vlgmr.msra.gmra.mxu3 %vm183_vm4, %v905_v16 }
0x11a6   :  { %1305 = vmatpush.bf16.msra.mxu3 %v1890_v24 }
0x11aa   :  { %1306 = vmatpush.bf16.msra.mxu3 %v1896_v26 }
0x1218   :  { %v1953_v33 = vpop.f32.mrf.mxu3 }
0x1220   :  { %v716_v34 = vpop.f32.mrf.mxu3 }
0x1228   :  { %v918_v38 = vpop.f32.mrf.mxu3 }
0x1229   :  { %v922_v39 = vadd.f32 %v918_v38, %v818_v36 }
0x122b   :  { %v1450_v37 = vmul.f32 -1.442695, %v922_v39 }
0x122d   :  { %1540 = vpow2.f32 %v1450_v37 }
0x1230   :  { %v920_v40 = vpop.f32.mrf.mxu3 }
0x1233   :  { %v1541_v41 = vpop.eup %1540 }
0x1234   :  { %v927_v43 = vadd.f32 1.0, %v1541_v41 }
0x1236   :  { %1542 = vrcp.f32 %v927_v43  ;;  %v939_v24 = vand.u32 2147483648, %v927_v43  ;;  %v937_v47 = vand.u32 2147483647, %v927_v43  ;;  %vm933_vm5 = vweird.f32 %v927_v43 }
0x1237   :  { %1544 = vtanh.f32 %v922_v39 }
0x1238   :  { %v940_v20 = vor.u32 1.1754944e-38, %v939_v24  ;;  %vm938_vm6 = vcmp.eq.f32.partialorder %v937_v47, 8.507059e+37 }
0x123c   :  { %v1543_v44 = vpop.eup %1542 }
0x123d   :  { %v929_v45 = vmul.f32 %v1543_v44, %v927_v43  ;;  %vm934_vm3 = vweird.f32 %v1543_v44  ;;  %v1545_v49 = vpop.eup %1544 }
0x123e   :  { %vm935_vm0 = vmor %vm933_vm5, %vm934_vm3 }
0x123f   :  { %v930_v46 = vsub.f32 1.0, %v929_v45 }
0x1241   :  { %v931_v26 = vmul.f32 %v1543_v44, %v930_v46 }
0x1243   :  { %v932_v18 = vadd.f32 %v1543_v44, %v931_v26 }
0x1245   :  { %v936_v48 = vsel %vm935_vm0, %v1543_v44, %v932_v18 }
0x1246   :  { %v941_v51 = vsel %vm938_vm6, %v940_v20, %v936_v48 }
0x1247   :  { %v943_v52 = vsel %vm1746_vm8, %v1545_v49, %v941_v51 }
0x1248   :  { %946 = vrot.lane.b32.xlu0 %v943_v52, %s1611_s15  ;;  %v944_v57 = vmul.f32 %v943_v52, %v1928_v15 }
0x1250   :  { %423 = vrot.lane.b32.xlu0 %v1793_v12, %s1612_s16 }
0x12ba   :  { %v947_v53 = vpop.permute.xlu0 %946 }
0x12bb   :  { %v949_v54 = vmul.f32 %v947_v53, %v943_v52 }
0x12bd   :  { %951 = vrot.lane.b32.xlu1 %v949_v54, %s1612_s16 }
0x12c2   :  { %v424_v56 = vpop.permute.xlu0 %423 }
0x12c3   :  { %427 = vst.msk [vmem:[#allocation3 + $0x10] sm:$0xff] %vm183_vm4, %v424_v56 }
0x12c5   :  { %490 = vrot.lane.b32.xlu1 %v1817_v55, %s1612_s16 }
0x12ca   :  { %v765_v12 = vld [vmem:[#allocation3 + $0x10] sm:$0xff] }
0x132f   :  { %v952_v58 = vpop.permute.xlu1 %951 }
0x1330   :  { %v954_v59 = vadd.f32 %v952_v58, %v944_v57 }
0x1332   :  { %1546 = vtanh.f32 %v954_v59 }
0x1337   :  { %v491_v60 = vpop.permute.xlu1 %490 }
0x1338   :  { %v1547_v61 = vpop.eup %1546  ;;  %494 = vst.msk [vmem:[#allocation3 + $0x18] sm:$0xff] %vm183_vm4, %v491_v60 }
0x1339   :  { %957 = vrot.lane.b32.xlu2 %v1547_v61, %s1611_s15 }
0x133f   :  { %v766_v62 = vld [vmem:[#allocation3 + $0x18] sm:$0xff] }
0x1340   :  { %v786_v63 = vpack.c.bf16 %v766_v62, %v765_v12 }
0x1342   :  { %1445 = vmatmul.msk.bf16.gmra.mxu1 %vm183_vm4, %v786_v63 }
0x1393   :  { %v958_v3 = vpop.permute.xlu2 %957 }
0x1394   :  { %v1969_v4 = vmul.f32 %v958_v3, %v943_v52 }
0x1396   :  { %v967_v55 = vpack.c.bf16 %v1969_v4, %v1969_v4 }
0x1398   :  { %969 = vrot.lane.b32.xlu2 %v967_v55, %s1612_s16 }
0x13bf   :  { %v820_v1 = vpop.f32.mrf.mxu1 }
0x13c0   :  { %v821_v6 = vadd.f32 %v1917_v35, %v820_v1 }
0x13c7   :  { %v822_v46 = vpop.f32.mrf.mxu1 }
0x13c8   :  { %v823_v24 = vadd.f32 %v1917_v35, %v822_v46  ;;  %v1608_v46 = vld [vmem:[%s2101_s4] ss:$0 sm:$0xff] }
0x13f2   :  { %v970_v5 = vpop.permute.xlu2 %969 }
0x13f3   :  { %1451 = vmatmul.msk.bf16.vlgmr.msrb.gmra.mxu0 %vm183_vm4, %v970_v5 }
0x1470   :  { %v983_v7 = vpop.f32.mrf.mxu0 }
0x1471   :  { %v987_v8 = vadd.f32 %v983_v7, %v821_v6 }
0x1473   :  { %v1452_v9 = vmul.f32 -1.442695, %v987_v8 }
0x1475   :  { %1548 = vpow2.f32 %v1452_v9 }
0x1478   :  { %v985_v42 = vpop.f32.mrf.mxu0 }
0x147b   :  { %v1549_v11 = vpop.eup %1548 }
0x147c   :  { %v992_v13 = vadd.f32 1.0, %v1549_v11 }
0x147e   :  { %1550 = vrcp.f32 %v992_v13  ;;  %v1004_v21 = vand.u32 2147483648, %v992_v13  ;;  %v1002_v25 = vand.u32 2147483647, %v992_v13  ;;  %vm998_vm9 = vweird.f32 %v992_v13 }
0x147f   :  { %1552 = vtanh.f32 %v987_v8 }
0x1480   :  { %v1005_v2 = vor.u32 1.1754944e-38, %v1004_v21  ;;  %vm1003_vm11 = vcmp.eq.f32.partialorder %v1002_v25, 8.507059e+37 }
0x1484   :  { %v1551_v15 = vpop.eup %1550 }
0x1485   :  { %v994_v17 = vmul.f32 %v1551_v15, %v992_v13  ;;  %vm999_vm7 = vweird.f32 %v1551_v15  ;;  %v1553_v14 = vpop.eup %1552 }
0x1486   :  { %vm1000_vm10 = vmor %vm998_vm9, %vm999_vm7 }
0x1487   :  { %v995_v19 = vsub.f32 1.0, %v994_v17 }
0x1489   :  { %v996_v23 = vmul.f32 %v1551_v15, %v995_v19 }
0x148b   :  { %v997_v28 = vadd.f32 %v1551_v15, %v996_v23 }
0x148d   :  { %v1001_v30 = vsel %vm1000_vm10, %v1551_v15, %v997_v28 }
0x148e   :  { %v1006_v16 = vsel %vm1003_vm11, %v1005_v2, %v1001_v30 }
0x148f   :  { %v1008_v34 = vsel %vm1746_vm8, %v1553_v14, %v1006_v16 }
0x1490   :  { %1011 = vrot.lane.b32.xlu0 %v1008_v34, %s1611_s15  ;;  %v1009_v38 = vmul.f32 %v1008_v34, %v954_v59 }
0x1502   :  { %v1012_v0 = vpop.permute.xlu0 %1011 }
0x1503   :  { %v1014_v36 = vmul.f32 %v1012_v0, %v1008_v34 }
0x1505   :  { %1016 = vrot.lane.b32.xlu1 %v1014_v36, %s1612_s16 }
0x1577   :  { %v1017_v39 = vpop.permute.xlu1 %1016 }
0x1578   :  { %v1019_v37 = vadd.f32 %v1017_v39, %v1009_v38 }
0x157a   :  { %1554 = vtanh.f32 %v1019_v37 }
0x1580   :  { %v1555_v40 = vpop.eup %1554 }
0x1581   :  { %1022 = vrot.lane.b32.xlu2 %v1555_v40, %s1611_s15 }
0x15db   :  { %v1023_v41 = vpop.permute.xlu2 %1022 }
0x15dc   :  { %v1981_v43 = vmul.f32 %v1023_v41, %v1008_v34 }
0x15de   :  { %v1032_v44 = vpack.c.bf16 %v1981_v43, %v1981_v43 }
0x15e0   :  { %1034 = vrot.lane.b32.xlu0 %v1032_v44, %s1612_s16 }
0x1652   :  { %v1035_v45 = vpop.permute.xlu0 %1034 }
0x1653   :  { %1453 = vmatmul.msk.bf16.vlgmr.msrb.gmra.mxu2 %vm183_vm4, %v1035_v45 }
0x16d6   :  { %v1048_v26 = vpop.f32.mrf.mxu2 }
0x16d7   :  { %v1052_v47 = vadd.f32 %v1048_v26, %v823_v24  ;;  %v223_v24 = vadd.f32 %v1608_v46, %v1912_v32 }
0x16d9   :  { %v1454_v18 = vmul.f32 -1.442695, %v1052_v47  ;;  %v718_v26 = vadd.f32 %v1953_v33, %v223_v24 }
0x16db   :  { %1556 = vpow2.f32 %v1454_v18 }
0x16de   :  { %v1050_v20 = vpop.f32.mrf.mxu2 }
0x16e1   :  { %v1557_v48 = vpop.eup %1556 }
0x16e2   :  { %v1057_v49 = vadd.f32 1.0, %v1557_v48 }
0x16e4   :  { %1558 = vrcp.f32 %v1057_v49  ;;  %v1069_v54 = vand.u32 2147483648, %v1057_v49  ;;  %v1067_v57 = vand.u32 2147483647, %v1057_v49  ;;  %vm1063_vm13 = vweird.f32 %v1057_v49 }
0x16e5   :  { %1560 = vtanh.f32 %v1052_v47  ;;  %v1434_v47 = vmul.f32 -1.442695, %v718_v26 }
0x16e6   :  { %v1070_v59 = vor.u32 1.1754944e-38, %v1069_v54  ;;  %vm1068_vm15 = vcmp.eq.f32.partialorder %v1067_v57, 8.507059e+37 }
0x16ea   :  { %v1559_v51 = vpop.eup %1558 }
0x16eb   :  { %v1059_v52 = vmul.f32 %v1559_v51, %v1057_v49  ;;  %vm1064_vm12 = vweird.f32 %v1559_v51  ;;  %v1561_v61 = vpop.eup %1560 }
0x16ec   :  { %vm1065_vm14 = vmor %vm1063_vm13, %vm1064_vm12 }
0x16ed   :  { %v1060_v53 = vsub.f32 1.0, %v1059_v52 }
0x16ef   :  { %v1061_v56 = vmul.f32 %v1559_v51, %v1060_v53 }
0x16f1   :  { %v1062_v58 = vadd.f32 %v1559_v51, %v1061_v56 }
0x16f3   :  { %v1066_v60 = vsel %vm1065_vm14, %v1559_v51, %v1062_v58 }
0x16f4   :  { %v1071_v12 = vsel %vm1068_vm15, %v1070_v59, %v1066_v60 }
0x16f5   :  { %v1073_v62 = vsel %vm1746_vm8, %v1561_v61, %v1071_v12 }
0x16f6   :  { %1076 = vrot.lane.b32.xlu1 %v1073_v62, %s1611_s15  ;;  %v1074_v5 = vmul.f32 %v1073_v62, %v1019_v37 }
0x16fe   :  { %557 = vrot.lane.b32.xlu1 %v1835_v31, %s1612_s16 }
0x1768   :  { %v1077_v63 = vpop.permute.xlu1 %1076 }
0x1769   :  { %v1079_v3 = vmul.f32 %v1077_v63, %v1073_v62 }
0x176b   :  { %1081 = vrot.lane.b32.xlu2 %v1079_v3, %s1612_s16 }
0x1770   :  { %v558_v55 = vpop.permute.xlu1 %557 }
0x1771   :  { %561 = vst.msk [vmem:[#allocation3 + $0x20] sm:$0xff] %vm183_vm4, %v558_v55 }
0x1773   :  { %624 = vrot.lane.b32.xlu2 %v1874_v10, %s1612_s16 }
0x1778   :  { %v767_v31 = vld [vmem:[#allocation3 + $0x20] sm:$0xff] }
0x17c5   :  { %v1082_v1 = vpop.permute.xlu2 %1081 }
0x17c6   :  { %v1997_v6 = vadd.f32 %v1082_v1, %v1074_v5 }
0x17c8   :  { %1562 = vtanh.f32 %v1997_v6 }
0x17cd   :  { %v625_v7 = vpop.permute.xlu2 %624 }
0x17ce   :  { %v1563_v8 = vpop.eup %1562  ;;  %628 = vst.msk [vmem:[#allocation3 + $0x28] sm:$0xff] %vm183_vm4, %v625_v7 }
0x17cf   :  { %1087 = vrot.lane.b32.xlu0 %v1563_v8, %s1611_s15 }
0x17d5   :  { %v768_v9 = vld [vmem:[#allocation3 + $0x28] sm:$0xff] }
0x17d6   :  { %v787_v42 = vpack.c.bf16 %v768_v9, %v767_v31 }
0x17d8   :  { %1446 = vmatmul.msk.bf16.gmra.mxu1 %vm183_vm4, %v787_v42 }
0x1841   :  { %v1088_v11 = vpop.permute.xlu0 %1087 }
0x1842   :  { %v2003_v13 = vmul.f32 %v1088_v11, %v1073_v62 }
0x1844   :  { %v1097_v10 = vpack.c.bf16 %v2003_v13, %v2003_v13 }
0x1846   :  { %1099 = vrot.lane.b32.xlu0 %v1097_v10, %s1612_s16 }
0x1855   :  { %v825_v17 = vpop.f32.mrf.mxu1 }
0x1856   :  { %v826_v19 = vadd.f32 %v1917_v35, %v825_v17 }
0x18b8   :  { %v1100_v15 = vpop.permute.xlu0 %1099 }
0x18b9   :  { %1455 = vmatmul.msk.bf16.vlgmr.msrb.gmra.mxu3 %vm183_vm4, %v1100_v15 }
0x193c   :  { %v1113_v21 = vpop.f32.mrf.mxu3 }
0x193d   :  { %v1117_v23 = vadd.f32 %v1113_v21, %v826_v19 }
0x193f   :  { %v1456_v25 = vmul.f32 -1.442695, %v1117_v23 }
0x1941   :  { %1564 = vpow2.f32 %v1456_v25 }
0x1944   :  { %v1115_v28 = vpop.f32.mrf.mxu3 }
0x1947   :  { %v1565_v2 = vpop.eup %1564 }
0x1948   :  { %v1122_v30 = vadd.f32 1.0, %v1565_v2 }
0x194a   :  { %1566 = vrcp.f32 %v1122_v30  ;;  %v1134_v0 = vand.u32 2147483648, %v1122_v30  ;;  %v1132_v38 = vand.u32 2147483647, %v1122_v30  ;;  %vm1128_vm2 = vweird.f32 %v1122_v30 }
0x194b   :  { %1568 = vtanh.f32 %v1117_v23 }
0x194c   :  { %v1135_v37 = vor.u32 1.1754944e-38, %v1134_v0  ;;  %vm1133_vm5 = vcmp.eq.f32.partialorder %v1132_v38, 8.507059e+37  ;;  %1570 = vpow2.f32 %v1434_v47 }
0x1950   :  { %v1567_v14 = vpop.eup %1566 }
0x1951   :  { %v1124_v16 = vmul.f32 %v1567_v14, %v1122_v30  ;;  %vm1129_vm1 = vweird.f32 %v1567_v14  ;;  %v1569_v41 = vpop.eup %1568 }
0x1952   :  { %vm1130_vm3 = vmor %vm1128_vm2, %vm1129_vm1  ;;  %v1571_v18 = vpop.eup %1570 }
0x1953   :  { %v1125_v34 = vsub.f32 1.0, %v1124_v16  ;;  %v723_v20 = vadd.f32 1.0, %v1571_v18 }
0x1955   :  { %v1126_v36 = vmul.f32 %v1567_v14, %v1125_v34  ;;  %1572 = vrcp.f32 %v723_v20  ;;  %v735_v57 = vand.u32 2147483648, %v723_v20  ;;  %vm729_vm6 = vweird.f32 %v723_v20 }
0x1956   :  { %v733_v58 = vand.u32 2147483647, %v723_v20  ;;  %1574 = vtanh.f32 %v718_v26 }
0x1957   :  { %v1127_v39 = vadd.f32 %v1567_v14, %v1126_v36  ;;  %v736_v33 = vor.u32 1.1754944e-38, %v735_v57 }
0x1958   :  { %vm734_vm9 = vcmp.eq.f32.partialorder %v733_v58, 8.507059e+37 }
0x1959   :  { %v1131_v40 = vsel %vm1130_vm3, %v1567_v14, %v1127_v39 }
0x195a   :  { %v1136_v44 = vsel %vm1133_vm5, %v1135_v37, %v1131_v40 }
0x195b   :  { %v1138_v45 = vsel %vm1746_vm8, %v1569_v41, %v1136_v44  ;;  %v1573_v48 = vpop.eup %1572 }
0x195c   :  { %1141 = vrot.lane.b32.xlu1 %v1138_v45, %s1611_s15  ;;  %v725_v49 = vmul.f32 %v1573_v48, %v723_v20  ;;  %vm730_vm0 = vweird.f32 %v1573_v48  ;;  %v1575_v60 = vpop.eup %1574  ;;  %v1139_v12 = vmul.f32 %v1138_v45, %v1997_v6  ;;  %v827_v6 = vpop.f32.mrf.mxu1 }
0x195d   :  { %vm731_vm7 = vmor %vm729_vm6, %vm730_vm0  ;;  %v828_v9 = vadd.f32 %v1917_v35, %v827_v6 }
0x195e   :  { %v726_v51 = vsub.f32 1.0, %v725_v49 }
0x1960   :  { %v727_v52 = vmul.f32 %v1573_v48, %v726_v51 }
0x1962   :  { %v728_v54 = vadd.f32 %v1573_v48, %v727_v52 }
0x1964   :  { %v732_v32 = vsel %vm731_vm7, %v1573_v48, %v728_v54 }
0x1965   :  { %v737_v59 = vsel %vm734_vm9, %v736_v33, %v732_v32  ;;  %vm1394_vm9 = vcmask 7168  }
0x1966   :  { %v739_v61 = vsel %vm1746_vm8, %v1575_v60, %v737_v59 }
0x1967   :  { %v740_v16 = vmul.f32 %v739_v61, %v1932_v22 }
0x19ce   :  { %v1142_v53 = vpop.permute.xlu1 %1141 }
0x19cf   :  { %v1144_v56 = vmul.f32 %v1142_v53, %v1138_v45 }
0x19d1   :  { %1146 = vrot.lane.b32.xlu2 %v1144_v56, %s1612_s16 }
0x19d9   :  { %742 = vrot.lane.b32.xlu2 %v739_v61, %s1611_s15 }
0x1a2b   :  { %v1147_v62 = vpop.permute.xlu2 %1146 }
0x1a2c   :  { %v1149_v63 = vadd.f32 %v1147_v62, %v1139_v12 }
0x1a2e   :  { %1576 = vtanh.f32 %v1149_v63 }
0x1a33   :  { %v743_v7 = vpop.permute.xlu2 %742 }
0x1a34   :  { %v1577_v3 = vpop.eup %1576  ;;  %v745_v8 = vmul.f32 %v743_v7, %v739_v61 }
0x1a35   :  { %1152 = vrot.lane.b32.xlu0 %v1577_v3, %s1611_s15 }
0x1aa7   :  { %v1153_v55 = vpop.permute.xlu0 %1152 }
0x1aa8   :  { %v2024_v5 = vmul.f32 %v1153_v55, %v1138_v45 }
0x1aaa   :  { %v1162_v1 = vpack.c.bf16 %v2024_v5, %v2024_v5 }
0x1aac   :  { %1164 = vrot.lane.b32.xlu1 %v1162_v1, %s1612_s16 }
0x1ab4   :  { %747 = vrot.lane.b32.xlu1 %v745_v8, %s1612_s16 }
0x1b1e   :  { %v1165_v31 = vpop.permute.xlu1 %1164 }
0x1b1f   :  { %1457 = vmatmul.msk.bf16.vlgmr.msra.gmra.mxu0 %vm183_vm4, %v1165_v31 }
0x1b26   :  { %v748_v14 = vpop.permute.xlu1 %747 }
0x1b27   :  { %v750_v36 = vadd.f32 %v748_v14, %v740_v16 }
0x1b9c   :  { %v1178_v42 = vpop.f32.mrf.mxu0 }
0x1b9d   :  { %v1182_v11 = vadd.f32 %v1178_v42, %v828_v9 }
0x1b9f   :  { %v1458_v10 = vmul.f32 -1.442695, %v1182_v11 }
0x1ba1   :  { %1578 = vpow2.f32 %v1458_v10 }
0x1ba4   :  { %v1180_v15 = vpop.f32.mrf.mxu0 }
0x1ba7   :  { %v1579_v17 = vpop.eup %1578 }
0x1ba8   :  { %v1187_v19 = vadd.f32 1.0, %v1579_v17 }
0x1baa   :  { %1580 = vrcp.f32 %v1187_v19  ;;  %v1199_v28 = vand.u32 2147483648, %v1187_v19  ;;  %v1197_v30 = vand.u32 2147483647, %v1187_v19  ;;  %vm1193_vm11 = vweird.f32 %v1187_v19 }
0x1bab   :  { %1582 = vtanh.f32 %v1182_v11 }
0x1bac   :  { %v1200_v0 = vor.u32 1.1754944e-38, %v1199_v28  ;;  %vm1198_vm13 = vcmp.eq.f32.partialorder %v1197_v30, 8.507059e+37  ;;  %1584 = vtanh.f32 %v750_v36 }
0x1bb0   :  { %v1581_v21 = vpop.eup %1580 }
0x1bb1   :  { %v1189_v23 = vmul.f32 %v1581_v21, %v1187_v19  ;;  %vm1194_vm10 = vweird.f32 %v1581_v21  ;;  %v1583_v39 = vpop.eup %1582 }
0x1bb2   :  { %vm1195_vm12 = vmor %vm1193_vm11, %vm1194_vm10  ;;  %v1585_v41 = vpop.eup %1584 }
0x1bb3   :  { %v1190_v25 = vsub.f32 1.0, %v1189_v23 }
0x1bb5   :  { %v1191_v2 = vmul.f32 %v1581_v21, %v1190_v25 }
0x1bb7   :  { %v1192_v34 = vadd.f32 %v1581_v21, %v1191_v2 }
0x1bb9   :  { %v1196_v38 = vsel %vm1195_vm12, %v1581_v21, %v1192_v34 }
0x1bba   :  { %v1201_v37 = vsel %vm1198_vm13, %v1200_v0, %v1196_v38 }
0x1bbb   :  { %v1203_v40 = vsel %vm1746_vm8, %v1583_v39, %v1201_v37 }
0x1bbc   :  { %1206 = vrot.lane.b32.xlu0 %v1203_v40, %s1611_s15  ;;  %v1204_v24 = vmul.f32 %v1203_v40, %v1149_v63 }
0x1bc4   :  { %753 = vrot.lane.b32.xlu0 %v1585_v41, %s1611_s15 }
0x1c2e   :  { %v1207_v44 = vpop.permute.xlu0 %1206 }
0x1c2f   :  { %v1209_v22 = vmul.f32 %v1207_v44, %v1203_v40 }
0x1c31   :  { %1211 = vrot.lane.b32.xlu2 %v1209_v22, %s1612_s16 }
0x1c36   :  { %v754_v45 = vpop.permute.xlu0 %753 }
0x1c37   :  { %v756_v46 = vmul.f32 %v754_v45, %v739_v61 }
0x1c39   :  { %691 = vrot.lane.b32.xlu2 %v1937_v27, %s1612_s16  ;;  %758 = vrot.lane.b32.xlu0 %v756_v46, %s1612_s16 }
0x1c8b   :  { %v1212_v26 = vpop.permute.xlu2 %1211 }
0x1c8c   :  { %v1214_v47 = vadd.f32 %v1212_v26, %v1204_v24 }
0x1c8e   :  { %1586 = vtanh.f32 %v1214_v47 }
0x1c93   :  { %v692_v18 = vpop.permute.xlu2 %691 }
0x1c94   :  { %v1587_v20 = vpop.eup %1586  ;;  %695 = vst.msk [vmem:[#allocation3 + $0x30] sm:$0xff] %vm183_vm4, %v692_v18 }
0x1c95   :  { %1217 = vrot.lane.b32.xlu1 %v1587_v20, %s1611_s15 }
0x1c9b   :  { %v769_v49 = vld [vmem:[#allocation3 + $0x30] sm:$0xff] }
0x1cab   :  { %v759_v48 = vpop.permute.xlu0 %758 }
0x1cac   :  { %762 = vst.msk [vmem:[#allocation3 + $0x38] sm:$0xff] %vm183_vm4, %v759_v48  ;;  %v1474_v48 = vld [vmem:[%s2103_s5] ss:$0 sm:$0xff] }
0x1cb3   :  { %v770_v51 = vld [vmem:[#allocation3 + $0x38] sm:$0xff] }
0x1cb4   :  { %v788_v52 = vpack.c.bf16 %v770_v51, %v769_v49 }
0x1cb6   :  { %1447 = vmatmul.msk.bf16.gmra.mxu1 %vm183_vm4, %v788_v52 }
0x1d07   :  { %v1218_v27 = vpop.permute.xlu1 %1217 }
0x1d08   :  { %v2045_v53 = vmul.f32 %v1218_v27, %v1203_v40 }
0x1d0a   :  { %v1227_v54 = vpack.c.bf16 %v2045_v53, %v2045_v53 }
0x1d0c   :  { %1229 = vrot.lane.b32.xlu1 %v1227_v54, %s1612_s16 }
0x1d33   :  { %v830_v57 = vpop.f32.mrf.mxu1 }
0x1d34   :  { %v831_v58 = vadd.f32 %v1917_v35, %v830_v57 }
0x1d3b   :  { %v832_v14 = vpop.f32.mrf.mxu1 }
0x1d3c   :  { %v833_v16 = vadd.f32 %v1917_v35, %v832_v14 }
0x1d7e   :  { %v1230_v56 = vpop.permute.xlu1 %1229 }
0x1d7f   :  { %1459 = vmatmul.msk.bf16.vlgmr.msra.gmra.mxu2 %vm183_vm4, %v1230_v56 }
0x1e02   :  { %v1243_v32 = vpop.f32.mrf.mxu2 }
0x1e03   :  { %v1247_v33 = vadd.f32 %v1243_v32, %v831_v58 }
0x1e05   :  { %v1460_v59 = vmul.f32 -1.442695, %v1247_v33 }
0x1e07   :  { %1588 = vpow2.f32 %v1460_v59 }
0x1e0a   :  { %v1245_v60 = vpop.f32.mrf.mxu2 }
0x1e0d   :  { %v1589_v61 = vpop.eup %1588 }
0x1e0e   :  { %v1252_v12 = vadd.f32 1.0, %v1589_v61  ;;  %v12_v61 = vstv %s2104_s6 }
0x1e0f   :  { %13 = vst [vmem:[#allocation4] sm:$0x1] %v12_v61 }
0x1e10   :  { %1590 = vrcp.f32 %v1252_v12  ;;  %v1264_v55 = vand.u32 2147483648, %v1252_v12  ;;  %v1262_v7 = vand.u32 2147483647, %v1252_v12  ;;  %vm1258_vm15 = vweird.f32 %v1252_v12 }
0x1e11   :  { %1592 = vtanh.f32 %v1247_v33 }
0x1e12   :  { %v1265_v31 = vor.u32 1.1754944e-38, %v1264_v55  ;;  %vm1263_vm2 = vcmp.eq.f32.partialorder %v1262_v7, 8.507059e+37 }
0x1e16   :  { %v1591_v62 = vpop.eup %1590 }
0x1e17   :  { %v1254_v63 = vmul.f32 %v1591_v62, %v1252_v12  ;;  %vm1259_vm14 = vweird.f32 %v1591_v62  ;;  %v1593_v9 = vpop.eup %1592 }
0x1e18   :  { %vm1260_vm1 = vmor %vm1258_vm15, %vm1259_vm14 }
0x1e19   :  { %v1255_v3 = vsub.f32 1.0, %v1254_v63 }
0x1e1b   :  { %v1256_v1 = vmul.f32 %v1591_v62, %v1255_v3 }
0x1e1d   :  { %v1257_v8 = vadd.f32 %v1591_v62, %v1256_v1 }
0x1e1f   :  { %v1261_v6 = vsel %vm1260_vm1, %v1591_v62, %v1257_v8  ;;  %v1475_v62 = vld [vmem:[#allocation4] ss:$0 sm:$0xff] }
0x1e20   :  { %v1266_v42 = vsel %vm1263_vm2, %v1265_v31, %v1261_v6 }
0x1e21   :  { %v1268_v11 = vsel %vm1746_vm8, %v1593_v9, %v1266_v42 }
0x1e22   :  { %1271 = vrot.lane.b32.xlu2 %v1268_v11, %s1611_s15  ;;  %v1269_v17 = vmul.f32 %v1268_v11, %v1214_v47 }
0x1e7c   :  { %v1272_v10 = vpop.permute.xlu2 %1271 }
0x1e7d   :  { %v1274_v15 = vmul.f32 %v1272_v10, %v1268_v11 }
0x1e7f   :  { %1276 = vrot.lane.b32.xlu0 %v1274_v15, %s1612_s16 }
0x1ef1   :  { %v1277_v19 = vpop.permute.xlu0 %1276 }
0x1ef2   :  { %v1279_v21 = vadd.f32 %v1277_v19, %v1269_v17 }
0x1ef4   :  { %1594 = vtanh.f32 %v1279_v21 }
0x1efa   :  { %v1595_v23 = vpop.eup %1594 }
0x1efb   :  { %1282 = vrot.lane.b32.xlu1 %v1595_v23, %s1611_s15 }
0x1f6d   :  { %v1283_v25 = vpop.permute.xlu1 %1282 }
0x1f6e   :  { %v1285_v28 = vmul.f32 %v1283_v25, %v1268_v11 }
0x1f70   :  { %v1292_v2 = vpack.c.bf16 %v1285_v28, %v1285_v28 }
0x1f72   :  { %1294 = vrot.lane.b32.xlu2 %v1292_v2, %s1612_s16 }
0x1fcc   :  { %v1295_v30 = vpop.permute.xlu2 %1294 }
0x1fcd   :  { %1461 = vmatmul.msk.bf16.vlgmr.msra.gmra.mxu3 %vm183_vm4, %v1295_v30 }
0x2050   :  { %v1308_v34 = vpop.f32.mrf.mxu3 }
0x2051   :  { %v1312_v0 = vadd.f32 %v1308_v34, %v833_v16 }
0x2053   :  { %v1462_v36 = vmul.f32 -1.442695, %v1312_v0 }
0x2055   :  { %1596 = vpow2.f32 %v1462_v36 }
0x2058   :  { %v1310_v38 = vpop.f32.mrf.mxu3 }
0x205b   :  { %v1597_v39 = vpop.eup %1596 }
0x205c   :  { %v1317_v37 = vadd.f32 1.0, %v1597_v39 }
0x205e   :  { %1598 = vrcp.f32 %v1317_v37  ;;  %v1329_v22 = vand.u32 2147483648, %v1317_v37  ;;  %v1327_v46 = vand.u32 2147483647, %v1317_v37  ;;  %vm1323_vm5 = vweird.f32 %v1317_v37 }
0x205f   :  { %1600 = vtanh.f32 %v1312_v0 }
0x2060   :  { %v1330_v35 = vor.u32 1.1754944e-38, %v1329_v22  ;;  %vm1328_vm6 = vcmp.eq.f32.partialorder %v1327_v46, 8.507059e+37 }
0x2064   :  { %v1599_v40 = vpop.eup %1598 }
0x2065   :  { %v1319_v41 = vmul.f32 %v1599_v40, %v1317_v37  ;;  %vm1324_vm3 = vweird.f32 %v1599_v40  ;;  %v1601_v47 = vpop.eup %1600 }
0x2066   :  { %vm1325_vm0 = vmor %vm1323_vm5, %vm1324_vm3 }
0x2067   :  { %v1320_v44 = vsub.f32 1.0, %v1319_v41 }
0x2069   :  { %v1321_v45 = vmul.f32 %v1599_v40, %v1320_v44 }
0x206b   :  { %v1322_v24 = vadd.f32 %v1599_v40, %v1321_v45 }
0x206d   :  { %v1326_v26 = vsel %vm1325_vm0, %v1599_v40, %v1322_v24 }
0x206e   :  { %v1331_v18 = vsel %vm1328_vm6, %v1330_v35, %v1326_v26 }
0x206f   :  { %v1333_v20 = vsel %vm1746_vm8, %v1601_v47, %v1331_v18 }
0x2070   :  { %1336 = vrot.lane.b32.xlu0 %v1333_v20, %s1611_s15 }
0x2078   :  { %1359 = vrot.lane.b32.xlu0 %v1474_v48, %s1613_s23 }
0x2080   :  { %897 = vrot.lane.b32.xlu0 %v1942_v29, %s1612_s16 }
0x2088   :  { %1027 = vrot.lane.b32.xlu0 %v1981_v43, %s1612_s16 }
0x2090   :  { %1157 = vrot.lane.b32.xlu0 %v2024_v5, %s1612_s16  ;;  %v1334_v5 = vmul.f32 %v1333_v20, %v1279_v21 }
0x2098   :  { %1287 = vrot.lane.b32.xlu0 %v1285_v28, %s1612_s16 }
0x20e2   :  { %v1337_v50 = vpop.permute.xlu0 %1336 }
0x20e3   :  { %v1339_v49 = vmul.f32 %v1337_v50, %v1333_v20 }
0x20e5   :  { %1341 = vrot.lane.b32.xlu1 %v1339_v49, %s1612_s16 }
0x20ea   :  { %v1360_v51 = vpop.permute.xlu0 %1359 }
0x20f2   :  { %v898_v52 = vpop.permute.xlu0 %897 }
0x20f3   :  { %900 = vst.msk [vmem:[#allocation3] sm:$0xff] %vm183_vm4, %v898_v52 }
0x20fa   :  { %v1028_v27 = vpop.permute.xlu0 %1027 }
0x20fb   :  { %1030 = vst.msk [vmem:[#allocation3 + $0x10] sm:$0xff] %vm183_vm4, %v1028_v27 }
0x2102   :  { %v1158_v29 = vpop.permute.xlu0 %1157 }
0x2103   :  { %1160 = vst.msk [vmem:[#allocation3 + $0x20] sm:$0xff] %vm183_vm4, %v1158_v29 }
0x210a   :  { %v1288_v43 = vpop.permute.xlu0 %1287 }
0x210b   :  { %1290 = vst.msk [vmem:[#allocation3 + $0x30] sm:$0xff] %vm183_vm4, %v1288_v43 }
0x2157   :  { %v1342_v54 = vpop.permute.xlu1 %1341 }
0x2158   :  { %v1344_v56 = vadd.f32 %v1342_v54, %v1334_v5 }
0x215a   :  { %1602 = vtanh.f32 %v1344_v56 }
0x2160   :  { %v1603_v57 = vpop.eup %1602 }
0x2161   :  { %1347 = vrot.lane.b32.xlu2 %v1603_v57, %s1611_s15 }
0x21bb   :  { %v1348_v58 = vpop.permute.xlu2 %1347 }
0x21bc   :  { %v1350_v32 = vmul.f32 %v1348_v58, %v1333_v20 }
0x21be   :  { %v1362_v33 = vmul.f32 %v1360_v51, %v1350_v32 }
0x21c0   :  { %1364 = vrot.lane.b32.xlu1 %v1362_v33, %s1612_s16 }
0x21c8   :  { %962 = vrot.lane.b32.xlu1 %v1969_v4, %s1612_s16 }
0x21d0   :  { %1092 = vrot.lane.b32.xlu1 %v2003_v13, %s1612_s16 }
0x21d8   :  { %1222 = vrot.lane.b32.xlu1 %v2045_v53, %s1612_s16 }
0x21e0   :  { %1352 = vrot.lane.b32.xlu1 %v1350_v32, %s1612_s16 }
0x2232   :  { %v1365_v59 = vpop.permute.xlu1 %1364 }
0x2233   :  { %v1367_v60 = vsel %vm183_vm4, %v1365_v59, 0.0 }
0x2234   :  { %1368 = vadd.xlane.f32.xlu2 %v1367_v60 }
0x223a   :  { %v963_v12 = vpop.permute.xlu1 %962 }
0x223b   :  { %965 = vst.msk [vmem:[#allocation3 + $0x8] sm:$0xff] %vm183_vm4, %v963_v12 }
0x2242   :  { %v1093_v4 = vpop.permute.xlu1 %1092 }
0x2243   :  { %1095 = vst.msk [vmem:[#allocation3 + $0x18] sm:$0xff] %vm183_vm4, %v1093_v4 }
0x224a   :  { %v1223_v13 = vpop.permute.xlu1 %1222 }
0x224b   :  { %1225 = vst.msk [vmem:[#allocation3 + $0x28] sm:$0xff] %vm183_vm4, %v1223_v13 }
0x2252   :  { %v1353_v53 = vpop.permute.xlu1 %1352 }
0x2253   :  { %1355 = vst.msk [vmem:[#allocation3 + $0x38] sm:$0xff] %vm183_vm4, %v1353_v53 }
0x22a7   :  { %v1369_v63 = vpop.xlane.xlu2 %1368 }
0x22a8   :  { %v1374_v3 = vadd.f32 %v1475_v62, %v1369_v63 }
0x22aa   :  { %v1463_v55 = vmul.f32 -1.442695, %v1374_v3 }
0x22ac   :  { %1604 = vpow2.f32 %v1463_v55 }
0x22b2   :  { %v1605_v1 = vpop.eup %1604 }
0x22b3   :  { %v1378_v7 = vadd.f32 1.0, %v1605_v1 }
0x22b5   :  { %1606 = vrcp.f32 %v1378_v7  ;;  %v1390_v9 = vand.u32 2147483648, %v1378_v7  ;;  %v1388_v11 = vand.u32 2147483647, %v1378_v7  ;;  %vm1384_vm7 = vweird.f32 %v1378_v7 }
0x22b7   :  { %v1391_v15 = vor.u32 1.1754944e-38, %v1390_v9  ;;  %vm1389_vm4 = vcmp.eq.f32.partialorder %v1388_v11, 8.507059e+37 }
0x22bb   :  { %v1607_v8 = vpop.eup %1606 }
0x22bc   :  { %v1380_v31 = vmul.f32 %v1607_v8, %v1378_v7  ;;  %vm1385_vm8 = vweird.f32 %v1607_v8 }
0x22bd   :  { %vm1386_vm10 = vmor %vm1384_vm7, %vm1385_vm8 }
0x22be   :  { %v1381_v6 = vsub.f32 1.0, %v1380_v31 }
0x22c0   :  { %v1382_v42 = vmul.f32 %v1607_v8, %v1381_v6 }
0x22c2   :  { %v1383_v10 = vadd.f32 %v1607_v8, %v1382_v42 }
0x22c4   :  { %v1387_v17 = vsel %vm1386_vm10, %v1607_v8, %v1383_v10 }
0x22c5   :  { %v1392_v19 = vsel %vm1389_vm4, %v1391_v15, %v1387_v17 }
0x22c6   :  { %1395 = vst.msk [vmem:[%s2105_s7] sm:$0xff] %vm1394_vm9, %v1392_v19 }

</bundles_post_ra>
